<compile_context>
chip_gen: v7x
topology: tpu7x:2x2x1
jax: 0.10.0
libtpu: 0.0.40
codegen_flags: <defaults>
</compile_context>

<pallas_src>
import functools

import numpy as np
import jax
import jax.numpy as jnp
from jax.experimental import pallas as pl
from jax.experimental.pallas import tpu as pltpu


# ---------------------------------------------------------------------------
# Parameters (PyTorch shape conventions).
# ---------------------------------------------------------------------------
def init_params(key, num_classes=10, in_ch=3):
    ks = jax.random.split(key, 10)

    def u(k, shape, fan_in):
        bound = 1.0 / (fan_in ** 0.5)
        return jax.random.uniform(k, shape, jnp.float32, -bound, bound)

    return {
        'conv1_w': u(ks[0], (6, in_ch, 5, 5), in_ch * 25),
        'conv1_b': u(ks[1], (6,), in_ch * 25),
        'conv2_w': u(ks[2], (16, 6, 5, 5), 6 * 25),
        'conv2_b': u(ks[3], (16,), 6 * 25),
        'fc1_w': u(ks[4], (120, 16 * 5 * 5), 16 * 5 * 5),
        'fc1_b': u(ks[5], (120,), 16 * 5 * 5),
        'fc2_w': u(ks[6], (84, 120), 120),
        'fc2_b': u(ks[7], (84,), 120),
        'fc3_w': u(ks[8], (num_classes, 84), 84),
        'fc3_b': u(ks[9], (num_classes,), 84),
    }


# ---------------------------------------------------------------------------
# One-time repack (outside jit) of PyTorch-layout params into banded,
# lane-dense kernel layouts.
# ---------------------------------------------------------------------------
def prepare_params(params, compute_dtype=jnp.bfloat16):
    c1 = np.asarray(params['conv1_w'], np.float32)     # (6, Cin, 5, 5)
    c2 = np.asarray(params['conv2_w'], np.float32)     # (16, 6, 5, 5)
    f1 = np.asarray(params['fc1_w'], np.float32)       # (120, 400)
    f2 = np.asarray(params['fc2_w'], np.float32)       # (84, 120)
    f3 = np.asarray(params['fc3_w'], np.float32)       # (nc, 84)
    cin = c1.shape[1]

    # conv1 as a banded matmul: rows j*cin + ci (j = input column 0..31),
    # cols kh*256 + pw*128 + ow*6 + co  (ow = pooled output col 0..13,
    # pw = column parity inside the 2x2 pool window).  Unused lanes are zero.
    w1b = np.zeros((32 * cin, 5 * 256), np.float32)
    for kh in range(5):
        for pw in range(2):
            for ow in range(14):
                base = kh * 256 + pw * 128 + ow * 6
                for kw in range(5):
                    j = 2 * ow + pw + kw
                    w1b[j * cin:(j + 1) * cin, base:base + 6] = c1[:, :, kh, kw].T

    # conv2: rows iw*6 + ci (iw = pool1 column 0..13),
    # cols kh*256 + pw*128 + ow*16 + co (ow = pooled output col 0..4).
    w2b = np.zeros((14 * 6, 5 * 256), np.float32)
    for kh in range(5):
        for pw in range(2):
            for ow in range(5):
                base = kh * 256 + pw * 128 + ow * 16
                for kw in range(5):
                    iw = 2 * ow + pw + kw
                    w2b[iw * 6:(iw + 1) * 6, base:base + 16] = c2[:, :, kh, kw].T

    # fc1: pool2 lanes are w*16 + c, rows are output row h; torch flattens
    # (B,16,5,5) as c*25 + h*5 + w.  One 128-aligned column block per h.
    f1r = f1.reshape(120, 16, 5, 5)                              # (n, c, h, w)
    wf1 = np.zeros((80, 5 * 128), np.float32)
    for h in range(5):
        blk = np.transpose(f1r[:, :, h, :], (2, 1, 0)).reshape(80, 120)  # (w*16+c, n)
        wf1[:, h * 128:h * 128 + 120] = blk

    def cvt(a):
        return jnp.asarray(a, compute_dtype)

    return {
        'w1b': cvt(w1b), 'w2b': cvt(w2b), 'wf1': cvt(wf1),
        'wf2': cvt(f2.T), 'wf3': cvt(f3.T),
        'b1': jnp.asarray(np.tile(np.asarray(params['conv1_b'], np.float32), 14)[None, :]),
        'b2': jnp.asarray(np.tile(np.asarray(params['conv2_b'], np.float32), 5)[None, :]),
        'bf1': jnp.asarray(np.asarray(params['fc1_b'], np.float32)[None, :]),
        'bf2': jnp.asarray(np.asarray(params['fc2_b'], np.float32)[None, :]),
        'bf3': jnp.asarray(np.asarray(params['fc3_b'], np.float32)[None, :]),
    }


# ---------------------------------------------------------------------------
# The fused kernel.  Per grid step: block_b samples.
#   x block: (4, TB, 8, 32*Cin) f32 — plane r, row q holds image row 4q+r.
#   Output block: (TB*8, nc) f32   — row b*8 holds sample b's logits.
# ---------------------------------------------------------------------------
def _make_kernel(block_b):
    TB = block_b
    R = TB * 8

    def shift_rows(z, s):
        # row p -> z[p + s]; vacated trailing rows are zero (never read).
        if s == 0:
            return z
        pad = jnp.zeros((s, z.shape[1]), z.dtype)
        return jnp.concatenate([z[s:], pad], axis=0)

    def kernel(x_ref, w1b_ref, b1_ref, w2b_ref, b2_ref, wf1_ref, bf1_ref,
               wf2_ref, bf2_ref, wf3_ref, bf3_ref, o_ref):
        f32 = jnp.float32
        cdt = w1b_ref.dtype
        klanes = x_ref.shape[-1]

        # ---- Stage 1: conv1 (banded matmul) + bias + ReLU + 2x2 max-pool ----
        x = x_ref[...].reshape(4 * R, klanes).astype(cdt)        # rows r*R + b*8 + q
        z = jnp.dot(x, w1b_ref[...], preferred_element_type=f32)  # (4R, 1280)
        zshift = {}
        for r in range(4):
            zr = z[r * R:(r + 1) * R]
            zshift[(r, 0)] = zr
            zshift[(r, 1)] = shift_rows(zr, 1)

        pool1 = []
        for t in range(2):               # row parity of pool1 (= conv2 input row parity)
            y_rh = []
            for rh in range(2):          # row inside the 2x2 pooling window
                acc = None
                for kh in range(5):
                    m = 2 * t + rh + kh  # needed image row = 4*q1 + m
                    term = zshift[(m % 4, m // 4)][:, kh * 256:kh * 256 + 212]
                    acc = term if acc is None else acc + term
                y_rh.append(acc)
            ym = jnp.maximum(y_rh[0], y_rh[1])                   # (R, 212)
            pm = jnp.maximum(ym[:, 0:84], ym[:, 128:212])        # pool over column parity
            pool1.append(jnp.maximum(pm + b1_ref[...], 0.0))     # (R, 84), rows b*8+q1

        # ---- Stage 2: conv2 (banded matmul) + bias + ReLU + 2x2 max-pool ----
        p1 = jnp.concatenate(pool1, axis=0).astype(cdt)          # (2R, 84), t-major
        z2 = jnp.dot(p1, w2b_ref[...], preferred_element_type=f32)   # (2R, 1280)
        z2shift = {}
        for t in range(2):
            zt = z2[t * R:(t + 1) * R]
            for s in range(3):
                z2shift[(t, s)] = shift_rows(zt, s)

        y2_rh = []
        for rh in range(2):
            acc = None
            for kh in range(5):
                m = rh + kh              # needed pool1 row = 2*(oh'+m//2) + m%2
                term = z2shift[(m % 2, m // 2)][:, kh * 256:kh * 256 + 208]
                acc = term if acc is None else acc + term
            y2_rh.append(acc)
        y2m = jnp.maximum(y2_rh[0], y2_rh[1])
        p2m = jnp.maximum(y2m[:, 0:80], y2m[:, 128:208])
        pool2 = jnp.maximum(p2m + b2_ref[...], 0.0)              # (R, 80), rows b*8+h

        # ---- Stage 3: fc1 (single dot + row-shift combine), fc2, fc3 --------
        q = jnp.dot(pool2.astype(cdt), wf1_ref[...],
                    preferred_element_type=f32)                  # (R, 640)
        acc = None
        for h in range(5):
            term = shift_rows(q, h)[:, h * 128:h * 128 + 120]
            acc = term if acc is None else acc + term
        h1 = jnp.maximum(acc + bf1_ref[...], 0.0)                # (R, 120); row b*8 valid
        h2 = jnp.dot(h1.astype(cdt), wf2_ref[...],
                     preferred_element_type=f32) + bf2_ref[...]
        h2 = jnp.maximum(h2, 0.0)                                # (R, 84)
        out = jnp.dot(h2.astype(cdt), wf3_ref[...],
                      preferred_element_type=f32) + bf3_ref[...]
        o_ref[...] = out.astype(o_ref.dtype)                     # (R, nc)

    return kernel


# ---------------------------------------------------------------------------
# Forward pass wrapper: one pallas_call, batch-tiled "parallel" grid.
# ---------------------------------------------------------------------------
@functools.partial(jax.jit, static_argnames=('block_b',))
def cnn_cifar_forward(x_nchw, kp, block_b=8):
    B, cin, H, W = x_nchw.shape
    assert (H, W) == (32, 32), x_nchw.shape
    block_b = min(block_b, B)
    assert B % block_b == 0, (B, block_b)
    nc = kp['wf3'].shape[1]

    # Free rearrangement of the raw input (no im2col blow-up): NCHW -> NHWC ->
    # rows split mod 4 -> (4, B, 8, W*Cin).  Plane r, row q holds image row 4q+r.
    x = jnp.transpose(x_nchw, (0, 2, 3, 1)).reshape(B, 32, W * cin)
    x = x.reshape(B, 8, 4, W * cin)
    x_planes = jnp.transpose(x, (2, 0, 1, 3)).astype(jnp.float32)   # (4, B, 8, W*cin)

    TB = block_b
    grid = (B // TB,)

    def _full(a):
        nd = a.ndim
        return pl.BlockSpec(a.shape, lambda i, nd=nd: (0,) * nd)

    weights = (kp['w1b'], kp['b1'], kp['w2b'], kp['b2'], kp['wf1'], kp['bf1'],
               kp['wf2'], kp['bf2'], kp['wf3'], kp['bf3'])

    flops = 2 * B * (32 * (W * cin) * 1280 + 16 * 84 * 1280
                     + 8 * 80 * 640 + 8 * 120 * 84 + 8 * 84 * nc)
    bytes_accessed = (x_planes.size * x_planes.dtype.itemsize
                      + sum(int(w.size) * w.dtype.itemsize for w in weights)
                      + B * 8 * nc * 4)

    out = pl.pallas_call(
        _make_kernel(TB),
        out_shape=jax.ShapeDtypeStruct((B * 8, nc), jnp.float32),
        grid=grid,
        in_specs=[pl.BlockSpec((4, TB, 8, W * cin), lambda i: (0, i, 0, 0))]
                 + [_full(w) for w in weights],
        out_specs=pl.BlockSpec((TB * 8, nc), lambda i: (i, 0)),
        compiler_params=pltpu.CompilerParams(
            dimension_semantics=("parallel",)),
        cost_estimate=pl.CostEstimate(flops=flops, transcendentals=0,
                                      bytes_accessed=bytes_accessed),
    )(x_planes, *weights)

    # Row b*8 of each 8-row block holds sample b's logits.
    return out.reshape(B, 8, nc)[:, 0, :]


# ---------------------------------------------------------------------------
# Pure-JAX reference (correctness cross-check).
# ---------------------------------------------------------------------------
def _reference_forward(x, params):
    hp = jax.lax.Precision.HIGHEST
    y = jax.lax.conv_general_dilated(
        x, params['conv1_w'], (1, 1), 'VALID',
        dimension_numbers=('NCHW', 'OIHW', 'NCHW'), precision=hp)
    y = jax.nn.relu(y + params['conv1_b'][None, :, None, None])
    y = jax.lax.reduce_window(y, -jnp.inf, jax.lax.max, (1, 1, 2, 2), (1, 1, 2, 2), 'VALID')
    y = jax.lax.conv_general_dilated(
        y, params['conv2_w'], (1, 1), 'VALID',
        dimension_numbers=('NCHW', 'OIHW', 'NCHW'), precision=hp)
    y = jax.nn.relu(y + params['conv2_b'][None, :, None, None])
    y = jax.lax.reduce_window(y, -jnp.inf, jax.lax.max, (1, 1, 2, 2), (1, 1, 2, 2), 'VALID')
    y = y.reshape(y.shape[0], -1)
    y = jax.nn.relu(y @ params['fc1_w'].T + params['fc1_b'])
    y = jax.nn.relu(y @ params['fc2_w'].T + params['fc2_b'])
    return y @ params['fc3_w'].T + params['fc3_b']


if __name__ == "__main__":
    key = jax.random.PRNGKey(0)
    k_x, k_p = jax.random.split(key)

    num_classes = 10
    batch = 4
    # CIFAR geometry required by the 16*5*5 flatten: (B, 3, 32, 32) NCHW.
    x = jax.random.normal(k_x, (batch, 3, 32, 32), jnp.float32)
    params = init_params(k_p, num_classes=num_classes, in_ch=3)
    kparams = prepare_params(params)          # one-time weight repack, outside jit

    out = jax.block_until_ready(cnn_cifar_forward(x, kparams, block_b=2))

    assert out.shape == (batch, num_classes), out.shape
    assert bool(jnp.all(jnp.isfinite(out)))

    ref = _reference_forward(x, params)
    err = float(jnp.max(jnp.abs(out - ref)))
    # bf16 matmul operands with f32 accumulation -> loose-ish tolerance.
    assert bool(jnp.allclose(out, ref, rtol=2e-2, atol=2e-2)), err

    print("KERNEL_OK")
</pallas_src>

<mosaic_0001>
module attributes {stable_mosaic.version = 11 : i64} {
  func.func @kernel(%arg0: i32, %arg1: memref<4x2x8x96xf32, #tpu.memory_space<vmem>>, %arg2: memref<96x1280xbf16, #tpu.memory_space<vmem>>, %arg3: memref<1x84xf32, #tpu.memory_space<vmem>>, %arg4: memref<84x1280xbf16, #tpu.memory_space<vmem>>, %arg5: memref<1x80xf32, #tpu.memory_space<vmem>>, %arg6: memref<80x640xbf16, #tpu.memory_space<vmem>>, %arg7: memref<1x120xf32, #tpu.memory_space<vmem>>, %arg8: memref<120x84xbf16, #tpu.memory_space<vmem>>, %arg9: memref<1x84xf32, #tpu.memory_space<vmem>>, %arg10: memref<84x10xbf16, #tpu.memory_space<vmem>>, %arg11: memref<1x10xf32, #tpu.memory_space<vmem>>, %arg12: memref<16x10xf32, #tpu.memory_space<vmem>>) attributes {dimension_semantics = [#tpu.dimension_semantics<parallel>], iteration_bounds = array<i64: 2>, scalar_prefetch = 0 : i64, scratch_operands = 0 : i64, tpu.core_type = #tpu.core_type<tc>, window_params = [{transform_indices = @transform_0, window_bounds = array<i64: 4, 2, 8, 96>}, {pipeline_mode = #tpu.pipeline_mode<synchronous>, transform_indices = @transform_1, window_bounds = array<i64: 96, 1280>}, {pipeline_mode = #tpu.pipeline_mode<synchronous>, transform_indices = @transform_2, window_bounds = array<i64: 1, 84>}, {pipeline_mode = #tpu.pipeline_mode<synchronous>, transform_indices = @transform_3, window_bounds = array<i64: 84, 1280>}, {pipeline_mode = #tpu.pipeline_mode<synchronous>, transform_indices = @transform_4, window_bounds = array<i64: 1, 80>}, {pipeline_mode = #tpu.pipeline_mode<synchronous>, transform_indices = @transform_5, window_bounds = array<i64: 80, 640>}, {pipeline_mode = #tpu.pipeline_mode<synchronous>, transform_indices = @transform_6, window_bounds = array<i64: 1, 120>}, {pipeline_mode = #tpu.pipeline_mode<synchronous>, transform_indices = @transform_7, window_bounds = array<i64: 120, 84>}, {pipeline_mode = #tpu.pipeline_mode<synchronous>, transform_indices = @transform_8, window_bounds = array<i64: 1, 84>}, {pipeline_mode = #tpu.pipeline_mode<synchronous>, transform_indices = @transform_9, window_bounds = array<i64: 84, 10>}, {pipeline_mode = #tpu.pipeline_mode<synchronous>, transform_indices = @transform_10, window_bounds = array<i64: 1, 10>}, {transform_indices = @transform_11, window_bounds = array<i64: 16, 10>}]} {
    %c0 = arith.constant 0 : index
    %c0_0 = arith.constant 0 : index
    %c0_1 = arith.constant 0 : index
    %c0_2 = arith.constant 0 : index
    %0 = vector.load %arg1[%c0, %c0_0, %c0_1, %c0_2] : memref<4x2x8x96xf32, #tpu.memory_space<vmem>>, vector<4x2x8x96xf32>
    %1 = vector.shape_cast %0 : vector<4x2x8x96xf32> to vector<64x96xf32>
    %2 = arith.truncf %1 : vector<64x96xf32> to vector<64x96xbf16>
    %c0_3 = arith.constant 0 : index
    %c0_4 = arith.constant 0 : index
    %3 = vector.load %arg2[%c0_3, %c0_4] : memref<96x1280xbf16, #tpu.memory_space<vmem>>, vector<96x1280xbf16>
    %cst = arith.constant dense<0.000000e+00> : vector<64x1280xf32>
    %4 = tpu.matmul %2, %3, %cst {dimension_numbers = #tpu.dot_dimension_numbers<[1], [0], [0], [1], [0, 0, 1, 1], [], []>} : vector<64x96xbf16>, vector<96x1280xbf16>, vector<64x1280xf32> -> vector<64x1280xf32>
    %5 = vector.extract_strided_slice %4 {offsets = [0, 0], sizes = [16, 1280], strides = [1, 1]} : vector<64x1280xf32> to vector<16x1280xf32>
    %cst_5 = arith.constant 0.000000e+00 : f32
    %6 = vector.broadcast %cst_5 : f32 to vector<1x1280xf32>
    %7 = vector.extract_strided_slice %5 {offsets = [1, 0], sizes = [15, 1280], strides = [1, 1]} : vector<16x1280xf32> to vector<15x1280xf32>
    %8 = tpu.concatenate %7, %6 in 0 : vector<15x1280xf32>, vector<1x1280xf32> -> vector<16x1280xf32>
    %9 = vector.extract_strided_slice %4 {offsets = [16, 0], sizes = [16, 1280], strides = [1, 1]} : vector<64x1280xf32> to vector<16x1280xf32>
    %cst_6 = arith.constant 0.000000e+00 : f32
    %10 = vector.broadcast %cst_6 : f32 to vector<1x1280xf32>
    %11 = vector.extract_strided_slice %9 {offsets = [1, 0], sizes = [15, 1280], strides = [1, 1]} : vector<16x1280xf32> to vector<15x1280xf32>
    %12 = tpu.concatenate %11, %10 in 0 : vector<15x1280xf32>, vector<1x1280xf32> -> vector<16x1280xf32>
    %13 = vector.extract_strided_slice %4 {offsets = [32, 0], sizes = [16, 1280], strides = [1, 1]} : vector<64x1280xf32> to vector<16x1280xf32>
    %cst_7 = arith.constant 0.000000e+00 : f32
    %14 = vector.broadcast %cst_7 : f32 to vector<1x1280xf32>
    %15 = vector.extract_strided_slice %13 {offsets = [1, 0], sizes = [15, 1280], strides = [1, 1]} : vector<16x1280xf32> to vector<15x1280xf32>
    %16 = tpu.concatenate %15, %14 in 0 : vector<15x1280xf32>, vector<1x1280xf32> -> vector<16x1280xf32>
    %17 = vector.extract_strided_slice %4 {offsets = [48, 0], sizes = [16, 1280], strides = [1, 1]} : vector<64x1280xf32> to vector<16x1280xf32>
    %cst_8 = arith.constant 0.000000e+00 : f32
    %18 = vector.broadcast %cst_8 : f32 to vector<1x1280xf32>
    %19 = vector.extract_strided_slice %17 {offsets = [1, 0], sizes = [15, 1280], strides = [1, 1]} : vector<16x1280xf32> to vector<15x1280xf32>
    %20 = tpu.concatenate %19, %18 in 0 : vector<15x1280xf32>, vector<1x1280xf32> -> vector<16x1280xf32>
    %21 = vector.extract_strided_slice %5 {offsets = [0, 0], sizes = [16, 212], strides = [1, 1]} : vector<16x1280xf32> to vector<16x212xf32>
    %22 = vector.extract_strided_slice %9 {offsets = [0, 256], sizes = [16, 212], strides = [1, 1]} : vector<16x1280xf32> to vector<16x212xf32>
    %23 = arith.addf %21, %22 : vector<16x212xf32>
    %24 = vector.extract_strided_slice %13 {offsets = [0, 512], sizes = [16, 212], strides = [1, 1]} : vector<16x1280xf32> to vector<16x212xf32>
    %25 = arith.addf %23, %24 : vector<16x212xf32>
    %26 = vector.extract_strided_slice %17 {offsets = [0, 768], sizes = [16, 212], strides = [1, 1]} : vector<16x1280xf32> to vector<16x212xf32>
    %27 = arith.addf %25, %26 : vector<16x212xf32>
    %28 = vector.extract_strided_slice %8 {offsets = [0, 1024], sizes = [16, 212], strides = [1, 1]} : vector<16x1280xf32> to vector<16x212xf32>
    %29 = arith.addf %27, %28 : vector<16x212xf32>
    %30 = vector.extract_strided_slice %9 {offsets = [0, 0], sizes = [16, 212], strides = [1, 1]} : vector<16x1280xf32> to vector<16x212xf32>
    %31 = vector.extract_strided_slice %13 {offsets = [0, 256], sizes = [16, 212], strides = [1, 1]} : vector<16x1280xf32> to vector<16x212xf32>
    %32 = arith.addf %30, %31 : vector<16x212xf32>
    %33 = vector.extract_strided_slice %17 {offsets = [0, 512], sizes = [16, 212], strides = [1, 1]} : vector<16x1280xf32> to vector<16x212xf32>
    %34 = arith.addf %32, %33 : vector<16x212xf32>
    %35 = vector.extract_strided_slice %8 {offsets = [0, 768], sizes = [16, 212], strides = [1, 1]} : vector<16x1280xf32> to vector<16x212xf32>
    %36 = arith.addf %34, %35 : vector<16x212xf32>
    %37 = vector.extract_strided_slice %12 {offsets = [0, 1024], sizes = [16, 212], strides = [1, 1]} : vector<16x1280xf32> to vector<16x212xf32>
    %38 = arith.addf %36, %37 : vector<16x212xf32>
    %39 = arith.maximumf %29, %38 : vector<16x212xf32>
    %40 = vector.extract_strided_slice %39 {offsets = [0, 0], sizes = [16, 84], strides = [1, 1]} : vector<16x212xf32> to vector<16x84xf32>
    %41 = vector.extract_strided_slice %39 {offsets = [0, 128], sizes = [16, 84], strides = [1, 1]} : vector<16x212xf32> to vector<16x84xf32>
    %42 = arith.maximumf %40, %41 : vector<16x84xf32>
    %c0_9 = arith.constant 0 : index
    %c0_10 = arith.constant 0 : index
    %43 = vector.load %arg3[%c0_9, %c0_10] : memref<1x84xf32, #tpu.memory_space<vmem>>, vector<1x84xf32>
    %44 = vector.broadcast %43 : vector<1x84xf32> to vector<16x84xf32>
    %45 = arith.addf %42, %44 : vector<16x84xf32>
    %cst_11 = arith.constant 0.000000e+00 : f32
    %46 = vector.broadcast %cst_11 : f32 to vector<16x84xf32>
    %47 = arith.maximumf %45, %46 : vector<16x84xf32>
    %48 = vector.extract_strided_slice %13 {offsets = [0, 0], sizes = [16, 212], strides = [1, 1]} : vector<16x1280xf32> to vector<16x212xf32>
    %49 = vector.extract_strided_slice %17 {offsets = [0, 256], sizes = [16, 212], strides = [1, 1]} : vector<16x1280xf32> to vector<16x212xf32>
    %50 = arith.addf %48, %49 : vector<16x212xf32>
    %51 = vector.extract_strided_slice %8 {offsets = [0, 512], sizes = [16, 212], strides = [1, 1]} : vector<16x1280xf32> to vector<16x212xf32>
    %52 = arith.addf %50, %51 : vector<16x212xf32>
    %53 = vector.extract_strided_slice %12 {offsets = [0, 768], sizes = [16, 212], strides = [1, 1]} : vector<16x1280xf32> to vector<16x212xf32>
    %54 = arith.addf %52, %53 : vector<16x212xf32>
    %55 = vector.extract_strided_slice %16 {offsets = [0, 1024], sizes = [16, 212], strides = [1, 1]} : vector<16x1280xf32> to vector<16x212xf32>
    %56 = arith.addf %54, %55 : vector<16x212xf32>
    %57 = vector.extract_strided_slice %17 {offsets = [0, 0], sizes = [16, 212], strides = [1, 1]} : vector<16x1280xf32> to vector<16x212xf32>
    %58 = vector.extract_strided_slice %8 {offsets = [0, 256], sizes = [16, 212], strides = [1, 1]} : vector<16x1280xf32> to vector<16x212xf32>
    %59 = arith.addf %57, %58 : vector<16x212xf32>
    %60 = vector.extract_strided_slice %12 {offsets = [0, 512], sizes = [16, 212], strides = [1, 1]} : vector<16x1280xf32> to vector<16x212xf32>
    %61 = arith.addf %59, %60 : vector<16x212xf32>
    %62 = vector.extract_strided_slice %16 {offsets = [0, 768], sizes = [16, 212], strides = [1, 1]} : vector<16x1280xf32> to vector<16x212xf32>
    %63 = arith.addf %61, %62 : vector<16x212xf32>
    %64 = vector.extract_strided_slice %20 {offsets = [0, 1024], sizes = [16, 212], strides = [1, 1]} : vector<16x1280xf32> to vector<16x212xf32>
    %65 = arith.addf %63, %64 : vector<16x212xf32>
    %66 = arith.maximumf %56, %65 : vector<16x212xf32>
    %67 = vector.extract_strided_slice %66 {offsets = [0, 0], sizes = [16, 84], strides = [1, 1]} : vector<16x212xf32> to vector<16x84xf32>
    %68 = vector.extract_strided_slice %66 {offsets = [0, 128], sizes = [16, 84], strides = [1, 1]} : vector<16x212xf32> to vector<16x84xf32>
    %69 = arith.maximumf %67, %68 : vector<16x84xf32>
    %c0_12 = arith.constant 0 : index
    %c0_13 = arith.constant 0 : index
    %70 = vector.load %arg3[%c0_12, %c0_13] : memref<1x84xf32, #tpu.memory_space<vmem>>, vector<1x84xf32>
    %71 = vector.broadcast %70 : vector<1x84xf32> to vector<16x84xf32>
    %72 = arith.addf %69, %71 : vector<16x84xf32>
    %cst_14 = arith.constant 0.000000e+00 : f32
    %73 = vector.broadcast %cst_14 : f32 to vector<16x84xf32>
    %74 = arith.maximumf %72, %73 : vector<16x84xf32>
    %75 = tpu.concatenate %47, %74 in 0 : vector<16x84xf32>, vector<16x84xf32> -> vector<32x84xf32>
    %76 = arith.truncf %75 : vector<32x84xf32> to vector<32x84xbf16>
    %c0_15 = arith.constant 0 : index
    %c0_16 = arith.constant 0 : index
    %77 = vector.load %arg4[%c0_15, %c0_16] : memref<84x1280xbf16, #tpu.memory_space<vmem>>, vector<84x1280xbf16>
    %cst_17 = arith.constant dense<0.000000e+00> : vector<32x1280xf32>
    %78 = tpu.matmul %76, %77, %cst_17 {dimension_numbers = #tpu.dot_dimension_numbers<[1], [0], [0], [1], [0, 0, 1, 1], [], []>} : vector<32x84xbf16>, vector<84x1280xbf16>, vector<32x1280xf32> -> vector<32x1280xf32>
    %79 = vector.extract_strided_slice %78 {offsets = [0, 0], sizes = [16, 1280], strides = [1, 1]} : vector<32x1280xf32> to vector<16x1280xf32>
    %cst_18 = arith.constant 0.000000e+00 : f32
    %80 = vector.broadcast %cst_18 : f32 to vector<1x1280xf32>
    %81 = vector.extract_strided_slice %79 {offsets = [1, 0], sizes = [15, 1280], strides = [1, 1]} : vector<16x1280xf32> to vector<15x1280xf32>
    %82 = tpu.concatenate %81, %80 in 0 : vector<15x1280xf32>, vector<1x1280xf32> -> vector<16x1280xf32>
    %cst_19 = arith.constant 0.000000e+00 : f32
    %83 = vector.broadcast %cst_19 : f32 to vector<2x1280xf32>
    %84 = vector.extract_strided_slice %79 {offsets = [2, 0], sizes = [14, 1280], strides = [1, 1]} : vector<16x1280xf32> to vector<14x1280xf32>
    %85 = tpu.concatenate %84, %83 in 0 : vector<14x1280xf32>, vector<2x1280xf32> -> vector<16x1280xf32>
    %86 = vector.extract_strided_slice %78 {offsets = [16, 0], sizes = [16, 1280], strides = [1, 1]} : vector<32x1280xf32> to vector<16x1280xf32>
    %cst_20 = arith.constant 0.000000e+00 : f32
    %87 = vector.broadcast %cst_20 : f32 to vector<1x1280xf32>
    %88 = vector.extract_strided_slice %86 {offsets = [1, 0], sizes = [15, 1280], strides = [1, 1]} : vector<16x1280xf32> to vector<15x1280xf32>
    %89 = tpu.concatenate %88, %87 in 0 : vector<15x1280xf32>, vector<1x1280xf32> -> vector<16x1280xf32>
    %cst_21 = arith.constant 0.000000e+00 : f32
    %90 = vector.broadcast %cst_21 : f32 to vector<2x1280xf32>
    %91 = vector.extract_strided_slice %86 {offsets = [2, 0], sizes = [14, 1280], strides = [1, 1]} : vector<16x1280xf32> to vector<14x1280xf32>
    %92 = tpu.concatenate %91, %90 in 0 : vector<14x1280xf32>, vector<2x1280xf32> -> vector<16x1280xf32>
    %93 = vector.extract_strided_slice %79 {offsets = [0, 0], sizes = [16, 208], strides = [1, 1]} : vector<16x1280xf32> to vector<16x208xf32>
    %94 = vector.extract_strided_slice %86 {offsets = [0, 256], sizes = [16, 208], strides = [1, 1]} : vector<16x1280xf32> to vector<16x208xf32>
    %95 = arith.addf %93, %94 : vector<16x208xf32>
    %96 = vector.extract_strided_slice %82 {offsets = [0, 512], sizes = [16, 208], strides = [1, 1]} : vector<16x1280xf32> to vector<16x208xf32>
    %97 = arith.addf %95, %96 : vector<16x208xf32>
    %98 = vector.extract_strided_slice %89 {offsets = [0, 768], sizes = [16, 208], strides = [1, 1]} : vector<16x1280xf32> to vector<16x208xf32>
    %99 = arith.addf %97, %98 : vector<16x208xf32>
    %100 = vector.extract_strided_slice %85 {offsets = [0, 1024], sizes = [16, 208], strides = [1, 1]} : vector<16x1280xf32> to vector<16x208xf32>
    %101 = arith.addf %99, %100 : vector<16x208xf32>
    %102 = vector.extract_strided_slice %86 {offsets = [0, 0], sizes = [16, 208], strides = [1, 1]} : vector<16x1280xf32> to vector<16x208xf32>
    %103 = vector.extract_strided_slice %82 {offsets = [0, 256], sizes = [16, 208], strides = [1, 1]} : vector<16x1280xf32> to vector<16x208xf32>
    %104 = arith.addf %102, %103 : vector<16x208xf32>
    %105 = vector.extract_strided_slice %89 {offsets = [0, 512], sizes = [16, 208], strides = [1, 1]} : vector<16x1280xf32> to vector<16x208xf32>
    %106 = arith.addf %104, %105 : vector<16x208xf32>
    %107 = vector.extract_strided_slice %85 {offsets = [0, 768], sizes = [16, 208], strides = [1, 1]} : vector<16x1280xf32> to vector<16x208xf32>
    %108 = arith.addf %106, %107 : vector<16x208xf32>
    %109 = vector.extract_strided_slice %92 {offsets = [0, 1024], sizes = [16, 208], strides = [1, 1]} : vector<16x1280xf32> to vector<16x208xf32>
    %110 = arith.addf %108, %109 : vector<16x208xf32>
    %111 = arith.maximumf %101, %110 : vector<16x208xf32>
    %112 = vector.extract_strided_slice %111 {offsets = [0, 0], sizes = [16, 80], strides = [1, 1]} : vector<16x208xf32> to vector<16x80xf32>
    %113 = vector.extract_strided_slice %111 {offsets = [0, 128], sizes = [16, 80], strides = [1, 1]} : vector<16x208xf32> to vector<16x80xf32>
    %114 = arith.maximumf %112, %113 : vector<16x80xf32>
    %c0_22 = arith.constant 0 : index
    %c0_23 = arith.constant 0 : index
    %115 = vector.load %arg5[%c0_22, %c0_23] : memref<1x80xf32, #tpu.memory_space<vmem>>, vector<1x80xf32>
    %116 = vector.broadcast %115 : vector<1x80xf32> to vector<16x80xf32>
    %117 = arith.addf %114, %116 : vector<16x80xf32>
    %cst_24 = arith.constant 0.000000e+00 : f32
    %118 = vector.broadcast %cst_24 : f32 to vector<16x80xf32>
    %119 = arith.maximumf %117, %118 : vector<16x80xf32>
    %120 = arith.truncf %119 : vector<16x80xf32> to vector<16x80xbf16>
    %c0_25 = arith.constant 0 : index
    %c0_26 = arith.constant 0 : index
    %121 = vector.load %arg6[%c0_25, %c0_26] : memref<80x640xbf16, #tpu.memory_space<vmem>>, vector<80x640xbf16>
    %cst_27 = arith.constant dense<0.000000e+00> : vector<16x640xf32>
    %122 = tpu.matmul %120, %121, %cst_27 {dimension_numbers = #tpu.dot_dimension_numbers<[1], [0], [0], [1], [0, 0, 1, 1], [], []>} : vector<16x80xbf16>, vector<80x640xbf16>, vector<16x640xf32> -> vector<16x640xf32>
    %123 = vector.extract_strided_slice %122 {offsets = [0, 0], sizes = [16, 120], strides = [1, 1]} : vector<16x640xf32> to vector<16x120xf32>
    %cst_28 = arith.constant 0.000000e+00 : f32
    %124 = vector.broadcast %cst_28 : f32 to vector<1x640xf32>
    %125 = vector.extract_strided_slice %122 {offsets = [1, 0], sizes = [15, 640], strides = [1, 1]} : vector<16x640xf32> to vector<15x640xf32>
    %126 = tpu.concatenate %125, %124 in 0 : vector<15x640xf32>, vector<1x640xf32> -> vector<16x640xf32>
    %127 = vector.extract_strided_slice %126 {offsets = [0, 128], sizes = [16, 120], strides = [1, 1]} : vector<16x640xf32> to vector<16x120xf32>
    %128 = arith.addf %123, %127 : vector<16x120xf32>
    %cst_29 = arith.constant 0.000000e+00 : f32
    %129 = vector.broadcast %cst_29 : f32 to vector<2x640xf32>
    %130 = vector.extract_strided_slice %122 {offsets = [2, 0], sizes = [14, 640], strides = [1, 1]} : vector<16x640xf32> to vector<14x640xf32>
    %131 = tpu.concatenate %130, %129 in 0 : vector<14x640xf32>, vector<2x640xf32> -> vector<16x640xf32>
    %132 = vector.extract_strided_slice %131 {offsets = [0, 256], sizes = [16, 120], strides = [1, 1]} : vector<16x640xf32> to vector<16x120xf32>
    %133 = arith.addf %128, %132 : vector<16x120xf32>
    %cst_30 = arith.constant 0.000000e+00 : f32
    %134 = vector.broadcast %cst_30 : f32 to vector<3x640xf32>
    %135 = vector.extract_strided_slice %122 {offsets = [3, 0], sizes = [13, 640], strides = [1, 1]} : vector<16x640xf32> to vector<13x640xf32>
    %136 = tpu.concatenate %135, %134 in 0 : vector<13x640xf32>, vector<3x640xf32> -> vector<16x640xf32>
    %137 = vector.extract_strided_slice %136 {offsets = [0, 384], sizes = [16, 120], strides = [1, 1]} : vector<16x640xf32> to vector<16x120xf32>
    %138 = arith.addf %133, %137 : vector<16x120xf32>
    %cst_31 = arith.constant 0.000000e+00 : f32
    %139 = vector.broadcast %cst_31 : f32 to vector<4x640xf32>
    %140 = vector.extract_strided_slice %122 {offsets = [4, 0], sizes = [12, 640], strides = [1, 1]} : vector<16x640xf32> to vector<12x640xf32>
    %141 = tpu.concatenate %140, %139 in 0 : vector<12x640xf32>, vector<4x640xf32> -> vector<16x640xf32>
    %142 = vector.extract_strided_slice %141 {offsets = [0, 512], sizes = [16, 120], strides = [1, 1]} : vector<16x640xf32> to vector<16x120xf32>
    %143 = arith.addf %138, %142 : vector<16x120xf32>
    %c0_32 = arith.constant 0 : index
    %c0_33 = arith.constant 0 : index
    %144 = vector.load %arg7[%c0_32, %c0_33] : memref<1x120xf32, #tpu.memory_space<vmem>>, vector<1x120xf32>
    %145 = vector.broadcast %144 : vector<1x120xf32> to vector<16x120xf32>
    %146 = arith.addf %143, %145 : vector<16x120xf32>
    %cst_34 = arith.constant 0.000000e+00 : f32
    %147 = vector.broadcast %cst_34 : f32 to vector<16x120xf32>
    %148 = arith.maximumf %146, %147 : vector<16x120xf32>
    %149 = arith.truncf %148 : vector<16x120xf32> to vector<16x120xbf16>
    %c0_35 = arith.constant 0 : index
    %c0_36 = arith.constant 0 : index
    %150 = vector.load %arg8[%c0_35, %c0_36] : memref<120x84xbf16, #tpu.memory_space<vmem>>, vector<120x84xbf16>
    %cst_37 = arith.constant dense<0.000000e+00> : vector<16x84xf32>
    %151 = tpu.matmul %149, %150, %cst_37 {dimension_numbers = #tpu.dot_dimension_numbers<[1], [0], [0], [1], [0, 0, 1, 1], [], []>} : vector<16x120xbf16>, vector<120x84xbf16>, vector<16x84xf32> -> vector<16x84xf32>
    %c0_38 = arith.constant 0 : index
    %c0_39 = arith.constant 0 : index
    %152 = vector.load %arg9[%c0_38, %c0_39] : memref<1x84xf32, #tpu.memory_space<vmem>>, vector<1x84xf32>
    %153 = vector.broadcast %152 : vector<1x84xf32> to vector<16x84xf32>
    %154 = arith.addf %151, %153 : vector<16x84xf32>
    %cst_40 = arith.constant 0.000000e+00 : f32
    %155 = vector.broadcast %cst_40 : f32 to vector<16x84xf32>
    %156 = arith.maximumf %154, %155 : vector<16x84xf32>
    %157 = arith.truncf %156 : vector<16x84xf32> to vector<16x84xbf16>
    %c0_41 = arith.constant 0 : index
    %c0_42 = arith.constant 0 : index
    %158 = vector.load %arg10[%c0_41, %c0_42] : memref<84x10xbf16, #tpu.memory_space<vmem>>, vector<84x10xbf16>
    %cst_43 = arith.constant dense<0.000000e+00> : vector<16x10xf32>
    %159 = tpu.matmul %157, %158, %cst_43 {dimension_numbers = #tpu.dot_dimension_numbers<[1], [0], [0], [1], [0, 0, 1, 1], [], []>} : vector<16x84xbf16>, vector<84x10xbf16>, vector<16x10xf32> -> vector<16x10xf32>
    %c0_44 = arith.constant 0 : index
    %c0_45 = arith.constant 0 : index
    %160 = vector.load %arg11[%c0_44, %c0_45] : memref<1x10xf32, #tpu.memory_space<vmem>>, vector<1x10xf32>
    %161 = vector.broadcast %160 : vector<1x10xf32> to vector<16x10xf32>
    %162 = arith.addf %159, %161 : vector<16x10xf32>
    %c0_46 = arith.constant 0 : index
    %c0_47 = arith.constant 0 : index
    %163 = vector.load %arg12[%c0_46, %c0_47] : memref<16x10xf32, #tpu.memory_space<vmem>>, vector<16x10xf32>
    tpu.vector_store %arg12[%c0_46, %c0_47], %162 {strides = array<i32>} : memref<16x10xf32, #tpu.memory_space<vmem>>, vector<16x10xf32>,
    return
  }
  func.func @transform_0(%arg0: i32) -> (i32, i32, i32, i32) {
    %c0_i32 = arith.constant 0 : i32
    %c0_i32_0 = arith.constant 0 : i32
    %c0_i32_1 = arith.constant 0 : i32
    %c0_i32_2 = arith.constant 0 : i32
    return %c0_i32, %arg0, %c0_i32_0, %c0_i32_1 : i32, i32, i32, i32
  }
  func.func @transform_1(%arg0: i32) -> (i32, i32) {
    %c0_i32 = arith.constant 0 : i32
    %c0_i32_0 = arith.constant 0 : i32
    %c0_i32_1 = arith.constant 0 : i32
    return %c0_i32, %c0_i32_0 : i32, i32
  }
  func.func @transform_2(%arg0: i32) -> (i32, i32) {
    %c0_i32 = arith.constant 0 : i32
    %c0_i32_0 = arith.constant 0 : i32
    %c0_i32_1 = arith.constant 0 : i32
    return %c0_i32, %c0_i32_0 : i32, i32
  }
  func.func @transform_3(%arg0: i32) -> (i32, i32) {
    %c0_i32 = arith.constant 0 : i32
    %c0_i32_0 = arith.constant 0 : i32
    %c0_i32_1 = arith.constant 0 : i32
    return %c0_i32, %c0_i32_0 : i32, i32
  }
  func.func @transform_4(%arg0: i32) -> (i32, i32) {
    %c0_i32 = arith.constant 0 : i32
    %c0_i32_0 = arith.constant 0 : i32
    %c0_i32_1 = arith.constant 0 : i32
    return %c0_i32, %c0_i32_0 : i32, i32
  }
  func.func @transform_5(%arg0: i32) -> (i32, i32) {
    %c0_i32 = arith.constant 0 : i32
    %c0_i32_0 = arith.constant 0 : i32
    %c0_i32_1 = arith.constant 0 : i32
    return %c0_i32, %c0_i32_0 : i32, i32
  }
  func.func @transform_6(%arg0: i32) -> (i32, i32) {
    %c0_i32 = arith.constant 0 : i32
    %c0_i32_0 = arith.constant 0 : i32
    %c0_i32_1 = arith.constant 0 : i32
    return %c0_i32, %c0_i32_0 : i32, i32
  }
  func.func @transform_7(%arg0: i32) -> (i32, i32) {
    %c0_i32 = arith.constant 0 : i32
    %c0_i32_0 = arith.constant 0 : i32
    %c0_i32_1 = arith.constant 0 : i32
    return %c0_i32, %c0_i32_0 : i32, i32
  }
  func.func @transform_8(%arg0: i32) -> (i32, i32) {
    %c0_i32 = arith.constant 0 : i32
    %c0_i32_0 = arith.constant 0 : i32
    %c0_i32_1 = arith.constant 0 : i32
    return %c0_i32, %c0_i32_0 : i32, i32
  }
  func.func @transform_9(%arg0: i32) -> (i32, i32) {
    %c0_i32 = arith.constant 0 : i32
    %c0_i32_0 = arith.constant 0 : i32
    %c0_i32_1 = arith.constant 0 : i32
    return %c0_i32, %c0_i32_0 : i32, i32
  }
  func.func @transform_10(%arg0: i32) -> (i32, i32) {
    %c0_i32 = arith.constant 0 : i32
    %c0_i32_0 = arith.constant 0 : i32
    %c0_i32_1 = arith.constant 0 : i32
    return %c0_i32, %c0_i32_0 : i32, i32
  }
  func.func @transform_11(%arg0: i32) -> (i32, i32) {
    %c0_i32 = arith.constant 0 : i32
    %c0_i32_0 = arith.constant 0 : i32
    return %arg0, %c0_i32 : i32, i32
  }
}

</mosaic_0001>

<bundles_post_ra>
// kernel: cnn_cifar_forward.1
= control target key start
LH: loop header
LB: loop body
LE: loop exit
PB: predicated region body
PF: predicated region fallthrough
CT: control target
= control target key end

     0   :  { %s3535_s17 = smov 0   ;;  %s3537_s18 = smov 0   ;;  %s4449_s0 = inlined_call_operand.vmem [shape: f32[4,4,8,96], index: 0, kind: input, shape index: {}]   ;;  %s4450_s1 = inlined_call_operand.vmem [shape: bf16[96,1280], index: 1, kind: input, shape index: {}]   ;;  %s4451_s2 = inlined_call_operand.vmem [shape: f32[1,84], index: 2, kind: input, shape index: {}]   ;;  %s4452_s3 = inlined_call_operand.vmem [shape: bf16[84,1280], index: 3, kind: input, shape index: {}]   ;;  %s4453_s4 = inlined_call_operand.vmem [shape: f32[1,80], index: 4, kind: input, shape index: {}]   ;;  %s4454_s5 = inlined_call_operand.vmem [shape: bf16[80,640], index: 5, kind: input, shape index: {}]   ;;  %s4455_s6 = inlined_call_operand.vmem [shape: f32[1,120], index: 6, kind: input, shape index: {}]   ;;  %s4456_s7 = inlined_call_operand.vmem [shape: bf16[120,84], index: 7, kind: input, shape index: {}]   ;;  %s4457_s8 = inlined_call_operand.vmem [shape: f32[1,84], index: 8, kind: input, shape index: {}]   ;;  %s4458_s9 = inlined_call_operand.vmem [shape: bf16[84,10], index: 9, kind: input, shape index: {}]   ;;  %s4459_s10 = inlined_call_operand.vmem [shape: f32[1,10], index: 10, kind: input, shape index: {}]   ;;  %s4460_s11 = inlined_call_operand.vmem [shape: f32[32,10], index: 11, kind: output, shape index: {}]  }
   0x1   :  { %s3539_s19 = smov 0  }
   0x2 LB: > { %s2879_s20 = sadd.s32 4294967295, %s3470_s19   ;;  %s3552_s21 = sadd.s32 1, %s3470_s19   ;;  %s3470_s19 = sphi %s3539_s19, %s4463_s19   ;;  %s3466_s18 = sphi %s3537_s18, %s4462_s18   ;;  %s3462_s17 = sphi %s3535_s17, %s4461_s17  }
   0x3   : > { %s25_s22 = ssub.s32 %s3470_s19, %s3552_s21  ;;  %s28_s23 = sadd.s32 1, %s3466_s18 }
   0x4   : > { %p26_p0 = scmp.eq.s32.totalorder %s25_s22, 0  ;;  %p35_p1 = scmp.ne.s32.totalorder %s3466_s18, %s3462_s17 }
   0x5   : > { %p36_p2 = scmp.eq.s32.totalorder %s3470_s19, 0  ;;  %p2882_p4 = scmp.ge.s32.totalorder %s3470_s19, 2 }
   0x6   : > { %s3561_s24 = scalar_select %p26_p0, %s3466_s18, %s28_s23  }
   0x7   : > { %p37_p3 = por %p36_p2, %p35_p1  ;;  %327 = sbr.rel (%p2882_p4) target bundleno = 22 (0x16), region = 56 }
   0xe   : > { %330 = sbr.rel (!%p37_p3) target bundleno = 22 (0x16), region = 60  ;;  %s332_s25 = sand.u32 (%p37_p3), 1, %s3466_s18  }
   0xf   : > { %s3096_s26 = sshll.u32 (%p37_p3), %s3470_s19, 4  ;;  %s2883_s27 = sshll.u32 (%p37_p3), %s332_s25, 6 }
  0x10   : > { %s337_s30 = scalar_lea.vmem (%p37_p3), %s4449_s0, %s3096_s26  ;;  %s334_s12 = scalar_lea.vmem (%p37_p3), [#allocation2], %s2883_s27 }
  0x11   : > { %v379_v0 = vld [vmem:[%s337_s30] sm:$0xff] (%p37_p3)  ;;  %v381_v1 = vld [vmem:[%s337_s30 + $0x8] sm:$0xff] (%p37_p3) }
  0x12   : > { %v383_v2 = vld [vmem:[%s337_s30 + $0x20] sm:$0xff] (%p37_p3)  ;;  %380 = vst [vmem:[%s334_s12] sm:$0xff] (%p37_p3), %v379_v0  ;;  %382 = vst [vmem:[%s334_s12 + $0x8] sm:$0xff] (%p37_p3), %v381_v1  ;;  %v385_v3 = vld [vmem:[%s337_s30 + $0x28] sm:$0xff] (%p37_p3) }
  0x13   : > { %384 = vst [vmem:[%s334_s12 + $0x10] sm:$0xff] (%p37_p3), %v383_v2  ;;  %v387_v4 = vld [vmem:[%s337_s30 + $0x40] sm:$0xff] (%p37_p3)  ;;  %v389_v5 = vld [vmem:[%s337_s30 + $0x48] sm:$0xff] (%p37_p3)  ;;  %386 = vst [vmem:[%s334_s12 + $0x18] sm:$0xff] (%p37_p3), %v385_v3 }
  0x14   : > { %388 = vst [vmem:[%s334_s12 + $0x20] sm:$0xff] (%p37_p3), %v387_v4  ;;  %390 = vst [vmem:[%s334_s12 + $0x28] sm:$0xff] (%p37_p3), %v389_v5  ;;  %v391_v6 = vld [vmem:[%s337_s30 + $0x60] sm:$0xff] (%p37_p3)  ;;  %v393_v7 = vld [vmem:[%s337_s30 + $0x68] sm:$0xff] (%p37_p3) }
  0x15   : > { %392 = vst [vmem:[%s334_s12 + $0x30] sm:$0xff] %v391_v6  ;;  %394 = vst [vmem:[%s334_s12 + $0x38] sm:$0xff] %v393_v7 }
  0x16 PF: > { %p2886_p5 = scmp.ge.s32.totalorder %s3470_s19, 1  ;;  %p399_p6 = scmp.lt.s32.totalorder %s3470_s19, 3 }
  0x18   : > { %p400_p7 = pnand %p2886_p5, %p399_p6 }
  0x19   : > { %v3224_v8 = vld [vmem:[%s4450_s1 + $0x4] ss:$40 sps:$4 sm:$0xff] (!%p400_p7)   ;;  %v3226_v9 = vld [vmem:[%s4450_s1] ss:$40 sps:$4 sm:$0xff] (!%p400_p7)   ;;  %v3472_v10 = vmov (!%p400_p7), 0   ;;  %s406_s14 = sand.u32 (!%p400_p7), 1, %s3462_s17  }
  0x1a   : > { %403 = sbr.rel (%p400_p7) target bundleno = 1396 (0x574), region = 98  ;;  %870 = vmatprep.mubr.bf16.mxu0 (!%p400_p7), %v3472_v10  ;;  %1162 = vmatprep.mubr.bf16.mxu1 (!%p400_p7), %v3472_v10  ;;  %v3227_v11 = vld [vmem:[%s4450_s1 + $0x54] ss:$40 sps:$4 sm:$0xff] (!%p400_p7)   ;;  %v3229_v12 = vld [vmem:[%s4450_s1 + $0x50] ss:$40 sps:$4 sm:$0xff] (!%p400_p7)   ;;  %s2887_s25 = sshll.u32 (!%p400_p7), %s406_s14, 6 }
  0x1b   : > { %838 = vmatprep.subr.bf16.mxu0 (!%p400_p7), %v3224_v8  ;;  %v3230_v13 = vld [vmem:[%s4450_s1 + $0xa4] ss:$40 sps:$4 sm:$0xff] (!%p400_p7)   ;;  %v3232_v14 = vld [vmem:[%s4450_s1 + $0xa0] ss:$40 sps:$4 sm:$0xff] (!%p400_p7)   ;;  %v3233_v15 = vld [vmem:[%s4450_s1 + $0xf4] ss:$40 sps:$4 sm:$0xff] (!%p400_p7)  }
  0x1c   : > { %839 = vmatpush1.bf16.msra.mxu0 (!%p400_p7), %v3226_v9  ;;  %v3235_v16 = vld [vmem:[%s4450_s1 + $0xf0] ss:$40 sps:$4 sm:$0xff] (!%p400_p7)   ;;  %v3236_v17 = vld [vmem:[%s4450_s1 + $0x144] ss:$40 sps:$4 sm:$0xff] (!%p400_p7)   ;;  %v3238_v18 = vld [vmem:[%s4450_s1 + $0x140] ss:$40 sps:$4 sm:$0xff] (!%p400_p7)  }
  0x1d   : > { %840 = vmatprep.subr.bf16.mxu0 (!%p400_p7), %v3227_v11  ;;  %v3239_v19 = vld [vmem:[%s4450_s1 + $0x194] ss:$40 sps:$4 sm:$0xff] (!%p400_p7)   ;;  %v3241_v20 = vld [vmem:[%s4450_s1 + $0x190] ss:$40 sps:$4 sm:$0xff] (!%p400_p7)   ;;  %s3610_s12 = scalar_lea.vmem (!%p400_p7), [#allocation2], %s2887_s25  ;;  %vm825_vm0 = vcmask (!%p400_p7), 785408  }
  0x1e   : > { %v453_v21 = vld [vmem:[%s3610_s12] sm:$0xff] (!%p400_p7)  ;;  %v454_v22 = vld [vmem:[%s3610_s12 + $0x8] sm:$0xff] (!%p400_p7)  ;;  %v455_v28 = vld [vmem:[%s3610_s12 + $0x10] sm:$0xff] (!%p400_p7)  ;;  %vm1794_vm1 = vcmask (!%p400_p7), 1041408   ;;  %vm1219_vm2 = vcmask (!%p400_p7), 1046528   ;;  %vm1787_vm3 = vcmask (!%p400_p7), 687104  }
  0x1f   : > { %v3244_v23 = vld [vmem:[%s4450_s1 + $0xc] ss:$40 sps:$4 sm:$0xff] (!%p400_p7)   ;;  %v3617_v24 = vpack.c.bf16 (!%p400_p7), %v454_v22, %v453_v21  ;;  %v3242_v25 = vld [vmem:[%s4450_s1 + $0x8] ss:$40 sps:$4 sm:$0xff] (!%p400_p7)   ;;  %v3247_v26 = vld [vmem:[%s4450_s1 + $0x5c] ss:$40 sps:$4 sm:$0xff] (!%p400_p7)  }
  0x20   : > { %841 = vmatpush1.bf16.msra.mxu0 (!%p400_p7), %v3229_v12  ;;  %v3245_v27 = vld [vmem:[%s4450_s1 + $0x58] ss:$40 sps:$4 sm:$0xff] (!%p400_p7)   ;;  %v3250_v30 = vld [vmem:[%s4450_s1 + $0xac] ss:$40 sps:$4 sm:$0xff] (!%p400_p7)   ;;  %v3248_v34 = vld [vmem:[%s4450_s1 + $0xa8] ss:$40 sps:$4 sm:$0xff] (!%p400_p7)  }
  0x21   : > { %842 = vmatprep.subr.bf16.mxu0 %v3230_v13  ;;  %v456_v29 = vld [vmem:[%s3610_s12 + $0x18] sm:$0xff]  ;;  %v3281_v31 = vld [vmem:[%s4450_s1 + $0x24] ss:$40 sps:$4 sm:$0xff]   ;;  %v3283_v32 = vld [vmem:[%s4450_s1 + $0x20] ss:$40 sps:$4 sm:$0xff]   ;;  %vm3474_vm4 = vmmov 0  }
  0x22   : > { %v3642_v33 = vpack.c.bf16 %v456_v29, %v455_v28  ;;  %1130 = vmatprep.subr.bf16.mxu1 %v3281_v31  ;;  %v3253_v35 = vld [vmem:[%s4450_s1 + $0xfc] ss:$40 sps:$4 sm:$0xff]   ;;  %v3289_v37 = vld [vmem:[%s4450_s1 + $0x70] ss:$40 sps:$4 sm:$0xff]   ;;  %v458_v40 = vld [vmem:[%s3610_s12 + $0x28] sm:$0xff]  ;;  %vm2130_vm5 = vcmask 1045504  }
  0x23   : > { %1131 = vmatpush1.bf16.msra.mxu1 %v3283_v32  ;;  %v3287_v36 = vld [vmem:[%s4450_s1 + $0x74] ss:$40 sps:$4 sm:$0xff]   ;;  %v3290_v38 = vld [vmem:[%s4450_s1 + $0xc4] ss:$40 sps:$4 sm:$0xff]   ;;  %v3251_v41 = vld [vmem:[%s4450_s1 + $0xf8] ss:$40 sps:$4 sm:$0xff]  }
  0x24   : > { %843 = vmatpush1.bf16.msra.mxu0 %v3232_v14  ;;  %1132 = vmatprep.subr.bf16.mxu1 %v3287_v36  ;;  %v457_v39 = vld [vmem:[%s3610_s12 + $0x20] sm:$0xff]  ;;  %v3256_v42 = vld [vmem:[%s4450_s1 + $0x14c] ss:$40 sps:$4 sm:$0xff]   ;;  %v3254_v46 = vld [vmem:[%s4450_s1 + $0x148] ss:$40 sps:$4 sm:$0xff]   ;;  %vm2413_vm6 = vcmask 654336  }
  0x25   : > { %844 = vmatprep.subr.bf16.mxu0 %v3233_v15  ;;  %v3295_v43 = vld [vmem:[%s4450_s1 + $0xc0] ss:$40 sps:$4 sm:$0xff]   ;;  %v3296_v44 = vld [vmem:[%s4450_s1 + $0x114] ss:$40 sps:$4 sm:$0xff]   ;;  %v3676_v45 = vpack.c.bf16 %v458_v40, %v457_v39  ;;  %v3298_v48 = vld [vmem:[%s4450_s1 + $0x110] ss:$40 sps:$4 sm:$0xff]  }
  0x26   : > { %v3259_v47 = vld [vmem:[%s4450_s1 + $0x19c] ss:$40 sps:$4 sm:$0xff]   ;;  %v459_v49 = vld [vmem:[%s3610_s12 + $0x30] sm:$0xff]  ;;  %v3257_v51 = vld [vmem:[%s4450_s1 + $0x198] ss:$40 sps:$4 sm:$0xff]   ;;  %vm2577_vm7 = vcmask 1043456  }
  0x27   : > { %1133 = vmatpush1.bf16.msra.mxu1 %v3289_v37  ;;  %v460_v50 = vld [vmem:[%s3610_s12 + $0x38] sm:$0xff]  ;;  %v3302_v52 = vld [vmem:[%s4450_s1 + $0x164] ss:$40 sps:$4 sm:$0xff]   ;;  %v3304_v54 = vld [vmem:[%s4450_s1 + $0x160] ss:$40 sps:$4 sm:$0xff]   ;;  %vm2566_vm8 = vcmask 1044480  }
  0x28   : > { %845 = vmatpush1.bf16.msra.mxu0 %v3235_v16  ;;  %1134 = vmatprep.subr.bf16.mxu1 %v3290_v38  ;;  %v3262_v53 = vld [vmem:[%s4450_s1 + $0x14] ss:$40 sps:$4 sm:$0xff]   ;;  %v3707_v56 = vpack.c.bf16 %v460_v50, %v459_v49  ;;  %v3310_v57 = vld [vmem:[%s4450_s1 + $0x1b0] ss:$40 sps:$4 sm:$0xff]   ;;  %v3265_v59 = vld [vmem:[%s4450_s1 + $0x64] ss:$40 sps:$4 sm:$0xff]  }
  0x29   : > { %846 = vmatprep.subr.bf16.mxu0 %v3236_v17  ;;  %v3308_v55 = vld [vmem:[%s4450_s1 + $0x1b4] ss:$40 sps:$4 sm:$0xff]   ;;  %v3260_v58 = vld [vmem:[%s4450_s1 + $0x10] ss:$40 sps:$4 sm:$0xff]   ;;  %v3263_v60 = vld [vmem:[%s4450_s1 + $0x60] ss:$40 sps:$4 sm:$0xff]  }
  0x2a   : > { %v3268_v61 = vld [vmem:[%s4450_s1 + $0xb4] ss:$40 sps:$4 sm:$0xff]   ;;  %v3266_v62 = vld [vmem:[%s4450_s1 + $0xb0] ss:$40 sps:$4 sm:$0xff]   ;;  %v3271_v63 = vld [vmem:[%s4450_s1 + $0x104] ss:$40 sps:$4 sm:$0xff]  }
  0x2b   : > { %1135 = vmatpush1.bf16.msra.mxu1 %v3295_v43  ;;  %v3269_v0 = vld [vmem:[%s4450_s1 + $0x100] ss:$40 sps:$4 sm:$0xff]   ;;  %v3274_v1 = vld [vmem:[%s4450_s1 + $0x154] ss:$40 sps:$4 sm:$0xff]   ;;  %v3272_v2 = vld [vmem:[%s4450_s1 + $0x150] ss:$40 sps:$4 sm:$0xff]  }
  0x2c   : > { %847 = vmatpush1.bf16.msra.mxu0 %v3238_v18  ;;  %1136 = vmatprep.subr.bf16.mxu1 %v3296_v44  ;;  %v3277_v3 = vld [vmem:[%s4450_s1 + $0x1a4] ss:$40 sps:$4 sm:$0xff]   ;;  %v3275_v4 = vld [vmem:[%s4450_s1 + $0x1a0] ss:$40 sps:$4 sm:$0xff]   ;;  %v3317_v22 = vld [vmem:[%s4452_s3 + $0x50] ss:$40 sps:$4 sm:$0xff]  }
  0x2d   : > { %848 = vmatprep.subr.bf16.mxu0 %v3239_v19  ;;  %v3280_v5 = vld [vmem:[%s4450_s1 + $0x1c] ss:$40 sps:$4 sm:$0xff]   ;;  %v3278_v6 = vld [vmem:[%s4450_s1 + $0x18] ss:$40 sps:$4 sm:$0xff]   ;;  %v3286_v7 = vld [vmem:[%s4450_s1 + $0x6c] ss:$40 sps:$4 sm:$0xff]  }
  0x2e   : > { %v3284_v8 = vld [vmem:[%s4450_s1 + $0x68] ss:$40 sps:$4 sm:$0xff]   ;;  %v3294_v9 = vld [vmem:[%s4450_s1 + $0xbc] ss:$40 sps:$4 sm:$0xff]   ;;  %v3292_v11 = vld [vmem:[%s4450_s1 + $0xb8] ss:$40 sps:$4 sm:$0xff]  }
  0x2f   : > { %1137 = vmatpush1.bf16.msra.mxu1 %v3298_v48  ;;  %v3301_v12 = vld [vmem:[%s4450_s1 + $0x10c] ss:$40 sps:$4 sm:$0xff]   ;;  %v3299_v13 = vld [vmem:[%s4450_s1 + $0x108] ss:$40 sps:$4 sm:$0xff]   ;;  %v3307_v14 = vld [vmem:[%s4450_s1 + $0x15c] ss:$40 sps:$4 sm:$0xff]  }
  0x30   : > { %849 = vmatpush1.bf16.msra.mxu0 %v3241_v20  ;;  %1138 = vmatprep.subr.bf16.mxu1 %v3302_v52  ;;  %v3305_v15 = vld [vmem:[%s4450_s1 + $0x158] ss:$40 sps:$4 sm:$0xff]   ;;  %v3313_v16 = vld [vmem:[%s4450_s1 + $0x1ac] ss:$40 sps:$4 sm:$0xff]   ;;  %v3311_v17 = vld [vmem:[%s4450_s1 + $0x1a8] ss:$40 sps:$4 sm:$0xff]  }
  0x31   : > { %911 = vmatprep.subr.bf16.mxu0 %v3244_v23  ;;  %v3314_v18 = vld [vmem:[%s4452_s3] ss:$40 sps:$4 sm:$0xff]   ;;  %v3316_v19 = vld [vmem:[%s4452_s3 + $0x4] ss:$40 sps:$4 sm:$0xff]   ;;  %v3319_v23 = vld [vmem:[%s4452_s3 + $0x54] ss:$40 sps:$4 sm:$0xff]  }
  0x32   : > { %v3322_v20 = vld [vmem:[%s4452_s3 + $0x24] ss:$40 sps:$4 sm:$0xff]   ;;  %v3320_v21 = vld [vmem:[%s4452_s3 + $0x20] ss:$40 sps:$4 sm:$0xff]   ;;  %v3329_v31 = vld [vmem:[%s4452_s3 + $0xf0] ss:$40 sps:$4 sm:$0xff]  }
  0x33   : > { %2950 = vmatmul.mubr.msk.bf16.vlgmr.msra.gmra.mrb[0].mxu0 %vm825_vm0, %v3617_v24  ;;  %1139 = vmatpush1.bf16.msra.mxu1 %v3304_v54  ;;  %v3334_v28 = vld [vmem:[%s4452_s3 + $0xc4] ss:$40 sps:$4 sm:$0xff]   ;;  %v3332_v29 = vld [vmem:[%s4452_s3 + $0xc0] ss:$40 sps:$4 sm:$0xff]   ;;  %v3337_v32 = vld [vmem:[%s4452_s3 + $0x114] ss:$40 sps:$4 sm:$0xff]  }
  0x34   : > { %912 = vmatpush1.bf16.msra.mxu0 %v3242_v25  ;;  %880 = vmatprep.mubr.bf16.mxu0 %v3472_v10  ;;  %v3326_v25 = vld [vmem:[%s4452_s3 + $0x70] ss:$40 sps:$4 sm:$0xff]   ;;  %v3343_v36 = vld [vmem:[%s4452_s3 + $0x164] ss:$40 sps:$4 sm:$0xff]   ;;  %v3341_v37 = vld [vmem:[%s4452_s3 + $0x160] ss:$40 sps:$4 sm:$0xff]  }
  0x35   : > { %913 = vmatprep.subr.bf16.mxu0 %v3247_v26  ;;  %1140 = vmatprep.subr.bf16.mxu1 %v3308_v55  ;;  %v3325_v26 = vld [vmem:[%s4452_s3 + $0xa4] ss:$40 sps:$4 sm:$0xff]   ;;  %v1507_v38 = vld [vmem:[%s4452_s3 + $0x190] sm:$0x33]  ;;  %vm2665_vm9 = vcmask 982016   ;;  %s2888_s14 = sshll.u32 %s2879_s20, 1 }
  0x36   : > { %v3022_v39 = vcombine.high %v1507_v38, %v1507_v38  ;;  %v3021_v40 = vcombine.low %v1507_v38, %v1507_v38  ;;  %p447_p8 = scmp.lt.s32.totalorder %s2888_s14, 3  ;;  %vm2814_vm10 = vcmask 80896  }
  0x37   : > { %1141 = vmatpush1.bf16.msra.mxu1 %v3310_v57 }
  0x38   : > { %914 = vmatpush1.bf16.msra.mxu0 %v3245_v27  ;;  %1825 = vmatprep.subr.bf16.mxu1 %v3316_v19  ;;  %v3323_v27 = vld [vmem:[%s4452_s3 + $0xa0] ss:$40 sps:$4 sm:$0xff]   ;;  %v1796_v44 = vsel %vm1794_vm1, %v3021_v40, 0  ;;  %s4465_s14 = smov (!%p447_p8, %s2888_s14), 3 }
  0x39   : > { %915 = vmatprep.subr.bf16.mxu0 %v3250_v30  ;;  %v3331_v30 = vld [vmem:[%s4452_s3 + $0xf4] ss:$40 sps:$4 sm:$0xff]   ;;  %s2889_s15 = sshll.u32 %s4465_s14, 3 }
  0x3a   : > { %2966 = vmatmul.mubr.msk.bf16.vlgmr.msra.gmra.mrb[0].mxu1 %vm825_vm0, %v3617_v24  ;;  %s450_s12 = scalar_lea.vmem %s4460_s11, %s2889_s15 }
  0x3b   : > { %2951 = vmatmul.mubr.msk.bf16.gmra.mrb[4].mxu0 %vm825_vm0, %v3642_v33  ;;  %1172 = vmatprep.mubr.bf16.mxu1 %v3472_v10 }
  0x3c   : > { %916 = vmatpush1.bf16.msra.mxu0 %v3248_v34  ;;  %890 = vmatprep.mubr.bf16.mxu0 %v3472_v10  ;;  %v3340_v34 = vld [vmem:[%s4452_s3 + $0x144] ss:$40 sps:$4 sm:$0xff]  }
  0x3d   : > { %917 = vmatprep.subr.bf16.mxu0 %v3253_v35  ;;  %1826 = vmatpush1.bf16.msra.mxu1 %v3314_v18  ;;  %v3338_v35 = vld [vmem:[%s4452_s3 + $0x140] ss:$40 sps:$4 sm:$0xff]  }
  0x3e   : > { %1827 = vmatprep.subr.bf16.mxu1 %v3319_v23 }
  0x40   : > { %918 = vmatpush1.bf16.msra.mxu0 %v3251_v41  ;;  %v1511_v41 = vld [vmem:[%s4452_s3 + $0x1b0] sm:$0x33] }
  0x41   : > { %919 = vmatprep.subr.bf16.mxu0 %v3256_v42  ;;  %1828 = vmatpush1.bf16.msra.mxu1 %v3317_v22  ;;  %v3030_v42 = vcombine.high %v1511_v41, %v1511_v41  ;;  %v3029_v43 = vcombine.low %v1511_v41, %v1511_v41 }
  0x42   : > { %2967 = vmatmul.mubr.msk.bf16.gmra.mrb[4].mxu1 %vm825_vm0, %v3642_v33  ;;  %1829 = vmatprep.subr.bf16.mxu1 %v3325_v26 }
  0x43   : > { %2952 = vmatmul.mubr.msk.bf16.gmra.mrb[8].mxu0 %vm825_vm0, %v3676_v45  ;;  %1182 = vmatprep.mubr.bf16.mxu1 %v3472_v10 }
  0x44   : > { %900 = vmatprep.mubr.bf16.mxu0 %v3472_v10  ;;  %920 = vmatpush1.bf16.msra.mxu0 %v3254_v46  ;;  %v3350_v46 = vld [vmem:[%s4452_s3 + $0xc] ss:$40 sps:$4 sm:$0xff]  }
  0x45   : > { %921 = vmatprep.subr.bf16.mxu0 %v3259_v47  ;;  %1830 = vmatpush1.bf16.msra.mxu1 %v3323_v27 }
  0x46   : > { %1831 = vmatprep.subr.bf16.mxu1 %v3331_v30 }
  0x48   : > { %922 = vmatpush1.bf16.msra.mxu0 %v3257_v51 }
  0x49   : > { %984 = vmatprep.subr.bf16.mxu0 %v3262_v53  ;;  %1832 = vmatpush1.bf16.msra.mxu1 %v3329_v31 }
  0x4a   : > { %2968 = vmatmul.mubr.msk.bf16.gmra.mrb[8].mxu1 %vm825_vm0, %v3676_v45  ;;  %1833 = vmatprep.subr.bf16.mxu1 %v3340_v34 }
  0x4b   : > { %2953 = vmatmul.mubr.msk.bf16.gmra.mrb[12].mxu0 %vm825_vm0, %v3707_v56  ;;  %1192 = vmatprep.mubr.bf16.mxu1 %v3472_v10 }
  0x4c   : > { %943 = vmatprep.mubr.bf16.mxu0 %v3472_v10 }
  0x4d   : > { %1834 = vmatpush1.bf16.msra.mxu1 %v3338_v35 }
  0x4e   : > { %3031 = vmatprep.subr.msk.bf16.mxu1 %vm1794_vm1, %v3022_v39 }
  0x51   : > { %1836 = vmatpush1.bf16.msra.mxu1 %v1796_v44 }
  0x52   : > { %2969 = vmatmul.mubr.msk.bf16.gmra.mrb[12].mxu1 %vm825_vm0, %v3707_v56  ;;  %1878 = vmatprep.subr.bf16.mxu1 %v3350_v46 }
  0x53   : > { %2954 = vmatmul.mubr.msk.bf16.vlgmr.msra.gmra.mrb[16].mxu0 %vm825_vm0, %v3617_v24  ;;  %1857 = vmatprep.mubr.bf16.mxu1 %v3472_v10 }
  0x54   : > { %985 = vmatpush1.bf16.msra.mxu0 %v3260_v58  ;;  %953 = vmatprep.mubr.bf16.mxu0 %v3472_v10 }
  0x55   : > { %986 = vmatprep.subr.bf16.mxu0 %v3265_v59 }
  0x58   : > { %987 = vmatpush1.bf16.msra.mxu0 %v3263_v60 }
  0x59   : > { %988 = vmatprep.subr.bf16.mxu0 %v3268_v61 }
  0x5b   : > { %2955 = vmatmul.mubr.msk.bf16.gmra.mrb[0].mxu0 %vm825_vm0, %v3642_v33 }
  0x5c   : > { %989 = vmatpush1.bf16.msra.mxu0 %v3266_v62  ;;  %963 = vmatprep.mubr.bf16.mxu0 %v3472_v10 }
  0x5d   : > { %990 = vmatprep.subr.bf16.mxu0 %v3271_v63 }
  0x60   : > { %991 = vmatpush1.bf16.msra.mxu0 %v3269_v0 }
  0x61   : > { %992 = vmatprep.subr.bf16.mxu0 %v3274_v1 }
  0x63   : > { %2956 = vmatmul.mubr.msk.bf16.gmra.mrb[4].mxu0 %vm825_vm0, %v3676_v45 }
  0x64   : > { %973 = vmatprep.mubr.bf16.mxu0 %v3472_v10  ;;  %993 = vmatpush1.bf16.msra.mxu0 %v3272_v2 }
  0x65   : > { %994 = vmatprep.subr.bf16.mxu0 %v3277_v3 }
  0x68   : > { %995 = vmatpush1.bf16.msra.mxu0 %v3275_v4 }
  0x69   : > { %1057 = vmatprep.subr.bf16.mxu0 %v3280_v5 }
  0x6b   : > { %2957 = vmatmul.mubr.msk.bf16.gmra.mrb[8].mxu0 %vm825_vm0, %v3707_v56 }
  0x6c   : > { %1016 = vmatprep.mubr.bf16.mxu0 %v3472_v10 }
  0x73   : > { %2958 = vmatmul.mubr.msk.bf16.vlgmr.msra.gmra.mrb[20].mxu0 %vm825_vm0, %v3617_v24 }
  0x74   : > { %1058 = vmatpush1.bf16.msra.mxu0 %v3278_v6  ;;  %1026 = vmatprep.mubr.bf16.mxu0 %v3472_v10 }
  0x75   : > { %1059 = vmatprep.subr.bf16.mxu0 %v3286_v7 }
  0x78   : > { %1060 = vmatpush1.bf16.msra.mxu0 %v3284_v8 }
  0x79   : > { %1061 = vmatprep.subr.bf16.mxu0 %v3294_v9 }
  0x7b   : > { %2959 = vmatmul.mubr.msk.bf16.gmra.mrb[24].mxu0 %vm825_vm0, %v3642_v33 }
  0x7c   : > { %1062 = vmatpush1.bf16.msra.mxu0 %v3292_v11  ;;  %1036 = vmatprep.mubr.bf16.mxu0 %v3472_v10 }
  0x7d   : > { %1063 = vmatprep.subr.bf16.mxu0 %v3301_v12 }
  0x80   : > { %1064 = vmatpush1.bf16.msra.mxu0 %v3299_v13 }
  0x81   : > { %1065 = vmatprep.subr.bf16.mxu0 %v3307_v14 }
  0x83   : > { %2960 = vmatmul.mubr.msk.bf16.gmra.mrb[0].mxu0 %vm825_vm0, %v3676_v45 }
  0x84   : > { %1046 = vmatprep.mubr.bf16.mxu0 %v3472_v10  ;;  %1066 = vmatpush1.bf16.msra.mxu0 %v3305_v15 }
  0x85   : > { %1067 = vmatprep.subr.bf16.mxu0 %v3313_v16 }
  0x88   : > { %1068 = vmatpush1.bf16.msra.mxu0 %v3311_v17 }
  0x89   : > { %2037 = vmatprep.subr.bf16.mxu0 %v3322_v20 }
  0x8b   : > { %2961 = vmatmul.mubr.msk.bf16.gmra.mrb[4].mxu0 %vm825_vm0, %v3707_v56 }
  0x8c   : > { %1089 = vmatprep.mubr.bf16.mxu0 %v3472_v10 }
  0x93   : > { %2962 = vmatmul.mubr.msk.bf16.vlgmr.msra.gmra.mrb[28].mxu0 %vm825_vm0, %v3617_v24  ;;  %v3328_v24 = vld [vmem:[%s4452_s3 + $0x74] ss:$40 sps:$4 sm:$0xff]  }
  0x94   : > { %1099 = vmatprep.mubr.bf16.mxu0 %v3472_v10  ;;  %2038 = vmatpush1.bf16.msra.mxu0 %v3320_v21 }
  0x95   : > { %2039 = vmatprep.subr.bf16.mxu0 %v3328_v24 }
  0x98   : > { %2040 = vmatpush1.bf16.msra.mxu0 %v3326_v25 }
  0x99   : > { %2041 = vmatprep.subr.bf16.mxu0 %v3334_v28 }
  0x9b   : > { %2963 = vmatmul.mubr.msk.bf16.gmra.mrb[32].mxu0 %vm825_vm0, %v3642_v33  ;;  %v3335_v33 = vld [vmem:[%s4452_s3 + $0x110] ss:$40 sps:$4 sm:$0xff]  }
  0x9c   : > { %1109 = vmatprep.mubr.bf16.mxu0 %v3472_v10  ;;  %2042 = vmatpush1.bf16.msra.mxu0 %v3332_v29 }
  0x9d   : > { %2043 = vmatprep.subr.bf16.mxu0 %v3337_v32 }
  0xa0   : > { %2044 = vmatpush1.bf16.msra.mxu0 %v3335_v33 }
  0xa1   : > { %2045 = vmatprep.subr.bf16.mxu0 %v3343_v36 }
  0xa3   : > { %2964 = vmatmul.mubr.msk.bf16.gmra.mrb[36].mxu0 %vm825_vm0, %v3676_v45  ;;  %v1820_v45 = vsel %vm1794_vm1, %v3029_v43, 0 }
  0xa4   : > { %1119 = vmatprep.mubr.bf16.mxu0 %v3472_v10  ;;  %2046 = vmatpush1.bf16.msra.mxu0 %v3341_v37 }
  0xa5   : > { %3043 = vmatprep.subr.msk.bf16.mxu0 %vm1794_vm1, %v3030_v42 }
  0xa8   : > { %2048 = vmatpush1.bf16.msra.mxu0 %v1820_v45 }
  0xab   : > { %2965 = vmatmul.mubr.msk.bf16.gmra.mrb[0].mxu0 %vm825_vm0, %v3707_v56 }
  0xac   : > { %2069 = vmatprep.mubr.bf16.mxu0 %v3472_v10 }
 0x10d   : > { %v1164_v51 = vpop.f32.mrb[0].mxu1 }
 0x10e   : > { %v1238_v52 = vrot.slane %v1164_v51, 1  ;;  %v1166_v53 = vpop.f32.mrb[1].mxu1 }
 0x10f   : > { %v1241_v54 = vrot.slane %v1166_v53, 1  ;;  %v3905_v55 = vpop.f32.mrb[2].mxu1 }
 0x110   : > { %v1239_v57 = vrot.slane %v3905_v55, 1  ;;  %v3908_v58 = vpop.f32.mrb[3].mxu1  ;;  %v2970_v55 = vld [vmem:[%s4451_s2] ss:$0 sm:$0xff] }
 0x111   : > { %v1242_v60 = vrot.slane %v3908_v58, 1 }
 0x112   : > { %v3914_v62 = vsel %vm1219_vm2, %v1238_v52, %v1239_v57 }
 0x113   : > { %v3919_v2 = vsel %vm1219_vm2, %v1241_v54, %v1242_v60 }
 0x115   : > { %v1174_v7 = vpop.f32.mrb[4].mxu1 }
 0x116   : > { %v1176_v13 = vpop.f32.mrb[5].mxu1  ;;  %v1292_v16 = vrot.slane %v1174_v7, 1 }
 0x117   : > { %v1295_v17 = vrot.slane %v1176_v13, 1  ;;  %v3933_v18 = vpop.f32.mrb[6].mxu1 }
 0x118   : > { %v1293_v19 = vrot.slane %v3933_v18, 1  ;;  %v3936_v20 = vpop.f32.mrb[7].mxu1 }
 0x119   : > { %v1296_v21 = vrot.slane %v3936_v20, 1 }
 0x11a   : > { %v3942_v22 = vsel %vm1219_vm2, %v1292_v16, %v1293_v19 }
 0x11b   : > { %v3947_v23 = vsel %vm1219_vm2, %v1295_v17, %v1296_v21 }
 0x11d   : > { %v1184_v24 = vpop.f32.mrb[8].mxu1 }
 0x11e   : > { %v902_v47 = vpop.f32.mrb[12].mxu0  ;;  %v1330_v25 = vrot.slane %v1184_v24, 1  ;;  %v1186_v26 = vpop.f32.mrb[9].mxu1 }
 0x11f   : > { %v904_v48 = vpop.f32.mrb[13].mxu0  ;;  %v1333_v27 = vrot.slane %v1186_v26, 1  ;;  %v3949_v28 = vpop.f32.mrb[10].mxu1 }
 0x120   : > { %v906_v49 = vpop.f32.mrb[14].mxu0  ;;  %v1331_v29 = vrot.slane %v3949_v28, 1  ;;  %v3952_v30 = vpop.f32.mrb[11].mxu1 }
 0x121   : > { %v908_v50 = vpop.f32.mrb[15].mxu0  ;;  %v1334_v31 = vrot.slane %v3952_v30, 1 }
 0x122   : > { %v3958_v32 = vsel %vm1219_vm2, %v1330_v25, %v1331_v29 }
 0x123   : > { %v3963_v33 = vsel %vm1219_vm2, %v1333_v27, %v1334_v31 }
 0x125   : > { %v1194_v34 = vpop.f32.mrb[12].mxu1 }
 0x126   : > { %v945_v56 = vpop.f32.mrb[16].mxu0  ;;  %v1352_v35 = vrot.slane %v1194_v34, 1  ;;  %v1196_v36 = vpop.f32.mrb[13].mxu1 }
 0x127   : > { %v947_v59 = vpop.f32.mrb[17].mxu0  ;;  %v1220_v63 = vrot.slane %v945_v56, 1  ;;  %v1355_v37 = vrot.slane %v1196_v36, 1  ;;  %v3965_v38 = vpop.f32.mrb[14].mxu1 }
 0x128   : > { %v949_v61 = vpop.f32.mrb[18].mxu0  ;;  %v1223_v3 = vrot.slane %v947_v59, 1  ;;  %v1353_v40 = vrot.slane %v3965_v38, 1  ;;  %v3968_v41 = vpop.f32.mrb[15].mxu1 }
 0x129   : > { %v1221_v0 = vrot.slane %v949_v61, 1  ;;  %v951_v1 = vpop.f32.mrb[19].mxu0  ;;  %v1356_v43 = vrot.slane %v3968_v41, 1 }
 0x12a   : > { %v1224_v4 = vrot.slane %v951_v1, 1  ;;  %v3974_v45 = vsel %vm1219_vm2, %v1352_v35, %v1353_v40 }
 0x12b   : > { %v1222_v5 = vsel %vm1219_vm2, %v1220_v63, %v1221_v0  ;;  %v1260_v6 = vsel %vm1219_vm2, %v1221_v0, 0.0 }
 0x12c   : > { %v3923_v8 = vadd.f32 %v1222_v5, %v902_v47  ;;  %v3925_v9 = vadd.f32 %v1260_v6, %v906_v49  ;;  %v1225_v11 = vsel %vm1219_vm2, %v1223_v3, %v1224_v4  ;;  %v1261_v12 = vsel %vm1219_vm2, %v1224_v4, 0.0 }
 0x12d   : > { %v3929_v14 = vadd.f32 %v1225_v11, %v904_v48  ;;  %v3931_v15 = vadd.f32 %v1261_v12, %v908_v50  ;;  %v3979_v47 = vsel %vm1219_vm2, %v1355_v37, %v1356_v43 }
 0x13e   : > { %v975_v39 = vpop.f32.mrb[8].mxu0 }
 0x13f   : > { %v977_v42 = vpop.f32.mrb[9].mxu0 }
 0x140   : > { %v979_v44 = vpop.f32.mrb[10].mxu0 }
 0x141   : > { %v981_v46 = vpop.f32.mrb[11].mxu0 }
 0x146   : > { %v1018_v48 = vpop.f32.mrb[20].mxu0 }
 0x147   : > { %v1020_v49 = vpop.f32.mrb[21].mxu0  ;;  %v1226_v51 = vrot.slane %v1018_v48, 1 }
 0x148   : > { %v1022_v50 = vpop.f32.mrb[22].mxu0  ;;  %v1229_v54 = vrot.slane %v1020_v49, 1 }
 0x149   : > { %v1227_v52 = vrot.slane %v1022_v50, 1  ;;  %v1024_v53 = vpop.f32.mrb[23].mxu0 }
 0x14a   : > { %v1230_v56 = vrot.slane %v1024_v53, 1 }
 0x14b   : > { %v1228_v59 = vsel %vm1219_vm2, %v1226_v51, %v1227_v52  ;;  %v1262_v61 = vsel %vm1219_vm2, %v1227_v52, 0.0 }
 0x14c   : > { %v1417_v63 = vadd.f32 %v1228_v59, %v975_v39  ;;  %v1419_v0 = vadd.f32 %v1262_v61, %v979_v44  ;;  %v1231_v1 = vsel %vm1219_vm2, %v1229_v54, %v1230_v56  ;;  %v1263_v3 = vsel %vm1219_vm2, %v1230_v56, 0.0 }
 0x14d   : > { %v1418_v4 = vadd.f32 %v1231_v1, %v977_v42  ;;  %v1420_v5 = vadd.f32 %v1263_v3, %v981_v46  ;;  %v1315_v59 = vsel %vm1219_vm2, %v1296_v21, 0.0 }
 0x14e   : > { %v1028_v6 = vpop.f32.mrb[24].mxu0 }
 0x14f   : > { %v1030_v7 = vpop.f32.mrb[25].mxu0  ;;  %v1280_v12 = vrot.slane %v1028_v6, 1 }
 0x150   : > { %v1032_v11 = vpop.f32.mrb[26].mxu0  ;;  %v1283_v17 = vrot.slane %v1030_v7, 1 }
 0x151   : > { %v1281_v13 = vrot.slane %v1032_v11, 1  ;;  %v1034_v16 = vpop.f32.mrb[27].mxu0 }
 0x152   : > { %v1284_v24 = vrot.slane %v1034_v16, 1 }
 0x153   : > { %v1282_v25 = vsel %vm1219_vm2, %v1280_v12, %v1281_v13  ;;  %v1310_v26 = vsel %vm1219_vm2, %v1281_v13, 0.0 }
 0x154   : > { %v3988_v27 = vadd.f32 %v3923_v8, %v1282_v25  ;;  %v3991_v34 = vadd.f32 %v3925_v9, %v1310_v26  ;;  %v1285_v35 = vsel %vm1219_vm2, %v1283_v17, %v1284_v24  ;;  %v1311_v36 = vsel %vm1219_vm2, %v1284_v24, 0.0 }
 0x155   : > { %v3996_v37 = vadd.f32 %v3929_v14, %v1285_v35  ;;  %v3999_v39 = vadd.f32 %v3931_v15, %v1311_v36  ;;  %v1314_v15 = vsel %vm1219_vm2, %v1293_v19, 0.0 }
 0x15e   : > { %v1048_v42 = vpop.f32.mrb[4].mxu0 }
 0x15f   : > { %v1050_v44 = vpop.f32.mrb[5].mxu0 }
 0x160   : > { %v1052_v46 = vpop.f32.mrb[6].mxu0 }
 0x161   : > { %v1054_v48 = vpop.f32.mrb[7].mxu0 }
 0x166   : > { %v1091_v49 = vpop.f32.mrb[28].mxu0 }
 0x167   : > { %v1093_v8 = vpop.f32.mrb[29].mxu0  ;;  %v1232_v51 = vrot.slane %v1091_v49, 1 }
 0x168   : > { %v1095_v50 = vpop.f32.mrb[30].mxu0  ;;  %v1235_v53 = vrot.slane %v1093_v8, 1 }
 0x169   : > { %v1233_v9 = vrot.slane %v1095_v50, 1  ;;  %v1097_v52 = vpop.f32.mrb[31].mxu0 }
 0x16a   : > { %v1236_v54 = vrot.slane %v1097_v52, 1 }
 0x16b   : > { %v1234_v56 = vsel %vm1219_vm2, %v1232_v51, %v1233_v9  ;;  %v1264_v14 = vsel %vm1219_vm2, %v1233_v9, 0.0 }
 0x16c   : > { %v1388_v61 = vadd.f32 %v1234_v56, %v1048_v42  ;;  %v1390_v1 = vadd.f32 %v1264_v14, %v1052_v46  ;;  %v1237_v3 = vsel %vm1219_vm2, %v1235_v53, %v1236_v54  ;;  %v1265_v6 = vsel %vm1219_vm2, %v1236_v54, 0.0 }
 0x16d   : > { %v1389_v7 = vadd.f32 %v1237_v3, %v1050_v44  ;;  %v1391_v11 = vadd.f32 %v1265_v6, %v1054_v48  ;;  %v1347_v44 = vsel %vm1219_vm2, %v1334_v31, 0.0 }
 0x16e   : > { %v4011_v12 = vadd.f32 %v1390_v1, %v1314_v15  ;;  %v1101_v13 = vpop.f32.mrb[32].mxu0  ;;  %v4014_v16 = vadd.f32 %v1388_v61, %v3942_v22  ;;  %v1346_v22 = vsel %vm1219_vm2, %v1331_v29, 0.0 }
 0x16f   : > { %v4016_v18 = vadd.f32 %v1391_v11, %v1315_v59  ;;  %v1103_v19 = vpop.f32.mrb[33].mxu0  ;;  %v4019_v20 = vadd.f32 %v1389_v7, %v3947_v23  ;;  %v1286_v17 = vrot.slane %v1101_v13, 1 }
 0x170   : > { %v1105_v21 = vpop.f32.mrb[34].mxu0  ;;  %v1289_v26 = vrot.slane %v1103_v19, 1 }
 0x171   : > { %v1287_v24 = vrot.slane %v1105_v21, 1  ;;  %v1107_v25 = vpop.f32.mrb[35].mxu0 }
 0x172   : > { %v1290_v35 = vrot.slane %v1107_v25, 1 }
 0x173   : > { %v1288_v36 = vsel %vm1219_vm2, %v1286_v17, %v1287_v24  ;;  %v1312_v42 = vsel %vm1219_vm2, %v1287_v24, 0.0 }
 0x174   : > { %v1421_v23 = vadd.f32 %v1417_v63, %v1288_v36  ;;  %v1423_v46 = vadd.f32 %v1419_v0, %v1312_v42  ;;  %v1291_v48 = vsel %vm1219_vm2, %v1289_v26, %v1290_v35  ;;  %v1313_v49 = vsel %vm1219_vm2, %v1290_v35, 0.0 }
 0x175   : > { %v1422_v8 = vadd.f32 %v1418_v4, %v1291_v48  ;;  %v1424_v50 = vadd.f32 %v1420_v5, %v1313_v49 }
 0x176   : > { %v1425_v51 = vadd.f32 %v1421_v23, %v3958_v32  ;;  %v1427_v9 = vadd.f32 %v1423_v46, %v1346_v22  ;;  %v1111_v52 = vpop.f32.mrb[36].mxu0  ;;  %v1362_v32 = vsel %vm1219_vm2, %v1353_v40, 0.0 }
 0x177   : > { %v1426_v28 = vadd.f32 %v1422_v8, %v3963_v33  ;;  %v1428_v53 = vadd.f32 %v1424_v50, %v1347_v44  ;;  %v1113_v29 = vpop.f32.mrb[37].mxu0  ;;  %v1324_v30 = vrot.slane %v1111_v52, 1  ;;  %v1363_v33 = vsel %vm1219_vm2, %v1356_v43, 0.0  ;;  %v3351_v8 = vld [vmem:[%s4452_s3 + $0x58] ss:$40 sps:$4 sm:$0xff]  }
 0x178   : > { %v1115_v54 = vpop.f32.mrb[38].mxu0  ;;  %v1327_v63 = vrot.slane %v1113_v29, 1  ;;  %v3356_v50 = vld [vmem:[%s4452_s3 + $0xac] ss:$40 sps:$4 sm:$0xff]   ;;  %v3357_v52 = vld [vmem:[%s4452_s3 + $0xf8] ss:$40 sps:$4 sm:$0xff]  }
 0x179   : > { %v1325_v56 = vrot.slane %v1115_v54, 1  ;;  %v1117_v31 = vpop.f32.mrb[39].mxu0  ;;  %v3360_v29 = vld [vmem:[%s4452_s3 + $0x148] ss:$40 sps:$4 sm:$0xff]  }
 0x17a   : > { %v1328_v0 = vrot.slane %v1117_v31, 1  ;;  %v3367_v31 = vld [vmem:[%s4452_s3 + $0x14] ss:$40 sps:$4 sm:$0xff]  }
 0x17b   : > { %v1326_v14 = vsel %vm1219_vm2, %v1324_v30, %v1325_v56  ;;  %v1344_v15 = vsel %vm1219_vm2, %v1325_v56, 0.0 }
 0x17c   : > { %v1437_v4 = vadd.f32 %v3988_v27, %v1326_v14  ;;  %v1439_v5 = vadd.f32 %v3991_v34, %v1344_v15  ;;  %v1329_v59 = vsel %vm1219_vm2, %v1327_v63, %v1328_v0  ;;  %v1345_v61 = vsel %vm1219_vm2, %v1328_v0, 0.0  ;;  %v3365_v63 = vld [vmem:[%s4452_s3 + $0x10] ss:$40 sps:$4 sm:$0xff]   ;;  %v3370_v0 = vld [vmem:[%s4452_s3 + $0x64] ss:$40 sps:$4 sm:$0xff]  }
 0x17d   : > { %v1438_v1 = vadd.f32 %v3996_v37, %v1329_v59  ;;  %v1440_v3 = vadd.f32 %v3999_v39, %v1345_v61  ;;  %v1266_v34 = vsel %vm1219_vm2, %v1239_v57, 0.0  ;;  %v3368_v14 = vld [vmem:[%s4452_s3 + $0x60] ss:$40 sps:$4 sm:$0xff]   ;;  %v3373_v15 = vld [vmem:[%s4452_s3 + $0xb4] ss:$40 sps:$4 sm:$0xff]  }
 0x17e   : > { %v1441_v38 = vadd.f32 %v1437_v4, %v3974_v45  ;;  %v1443_v6 = vadd.f32 %v1439_v5, %v1362_v32  ;;  %v1121_v40 = vpop.f32.mrb[0].mxu0  ;;  %v1267_v45 = vsel %vm1219_vm2, %v1242_v60, 0.0  ;;  %v3371_v32 = vld [vmem:[%s4452_s3 + $0xb0] ss:$40 sps:$4 sm:$0xff]   ;;  %v3374_v4 = vld [vmem:[%s4452_s3 + $0x100] ss:$40 sps:$4 sm:$0xff]  }
 0x17f   : > { %v1442_v41 = vadd.f32 %v1438_v1, %v3979_v47  ;;  %v1444_v7 = vadd.f32 %v1440_v3, %v1363_v33  ;;  %v1376_v43 = vadd.f32 %v3914_v62, %v1121_v40  ;;  %v1123_v27 = vpop.f32.mrb[1].mxu0  ;;  %v3376_v33 = vld [vmem:[%s4452_s3 + $0x104] ss:$40 sps:$4 sm:$0xff]   ;;  %v3379_v5 = vld [vmem:[%s4452_s3 + $0x154] ss:$40 sps:$4 sm:$0xff]  }
 0x180   : > { %v1445_v11 = vmax.f32 %v1425_v51, %v1441_v38  ;;  %v1447_v13 = vmax.f32 %v1427_v9, %v1443_v6  ;;  %v1377_v37 = vadd.f32 %v3919_v2, %v1123_v27  ;;  %v1125_v19 = vpop.f32.mrb[2].mxu0  ;;  %v3354_v51 = vld [vmem:[%s4452_s3 + $0xa8] ss:$40 sps:$4 sm:$0xff]   ;;  %v3359_v9 = vld [vmem:[%s4452_s3 + $0xfc] ss:$40 sps:$4 sm:$0xff]  }
 0x181   : > { %v1446_v39 = vmax.f32 %v1426_v28, %v1442_v41  ;;  %v1448_v21 = vmax.f32 %v1428_v53, %v1444_v7  ;;  %v1396_v47 = vmax.f32 %v1376_v43, %v4014_v16  ;;  %v1378_v17 = vadd.f32 %v1266_v34, %v1125_v19  ;;  %v1127_v62 = vpop.f32.mrb[3].mxu0  ;;  %v3362_v28 = vld [vmem:[%s4452_s3 + $0x14c] ss:$40 sps:$4 sm:$0xff]   ;;  %v1508_v53 = vld [vmem:[%s4452_s3 + $0x198] sm:$0x33] }
 0x182   : > { %v1397_v57 = vmax.f32 %v1377_v37, %v4019_v20  ;;  %v1379_v24 = vadd.f32 %v1267_v45, %v1127_v62  ;;  %v3348_v20 = vld [vmem:[%s4452_s3 + $0x8] ss:$40 sps:$4 sm:$0xff]   ;;  %v3024_v54 = vcombine.high %v1508_v53, %v1508_v53  ;;  %v3023_v30 = vcombine.low %v1508_v53, %v1508_v53  ;;  %v1509_v59 = vld [vmem:[%s4452_s3 + $0x1a0] sm:$0x33]  ;;  %v3387_v41 = vld [vmem:[%s4452_s3 + $0x6c] ss:$40 sps:$4 sm:$0xff]  }
 0x183   : > { %v1449_v25 = vmax.f32 %v1445_v11, %v1446_v39  ;;  %v1450_v2 = vmax.f32 %v1447_v13, %v1448_v21  ;;  %v1398_v26 = vmax.f32 %v1378_v17, %v4011_v12  ;;  %v3377_v61 = vld [vmem:[%s4452_s3 + $0x150] ss:$40 sps:$4 sm:$0xff]   ;;  %v3026_v1 = vcombine.high %v1509_v59, %v1509_v59  ;;  %v3384_v6 = vld [vmem:[%s4452_s3 + $0x1c] ss:$40 sps:$4 sm:$0xff]   ;;  %v3393_v34 = vld [vmem:[%s4452_s3 + $0x10c] ss:$40 sps:$4 sm:$0xff]  }
 0x184   : > { %v1400_v58 = vmax.f32 %v1396_v47, %v1397_v57  ;;  %v1399_v60 = vmax.f32 %v1379_v24, %v4016_v18  ;;  %v3353_v18 = vld [vmem:[%s4452_s3 + $0x5c] ss:$40 sps:$4 sm:$0xff]   ;;  %v1802_v56 = vsel %vm1794_vm1, %v3023_v30, 0  ;;  %v3025_v3 = vcombine.low %v1509_v59, %v1509_v59  ;;  %v3382_v40 = vld [vmem:[%s4452_s3 + $0x18] ss:$40 sps:$4 sm:$0xff]  }
 0x185   : > { %v1451_v35 = vadd.f32 %v2970_v55, %v1449_v25  ;;  %v1452_v36 = vadd.f32 %v2970_v55, %v1450_v2  ;;  %v3385_v7 = vld [vmem:[%s4452_s3 + $0x68] ss:$40 sps:$4 sm:$0xff]   ;;  %v3390_v43 = vld [vmem:[%s4452_s3 + $0xbc] ss:$40 sps:$4 sm:$0xff]   ;;  %v3388_v27 = vld [vmem:[%s4452_s3 + $0xb8] ss:$40 sps:$4 sm:$0xff]  }
 0x186   : > { %v1409_v42 = vadd.f32 %v2970_v55, %v1400_v58  ;;  %v1401_v16 = vmax.f32 %v1398_v26, %v1399_v60  ;;  %v1808_v38 = vsel %vm1794_vm1, %v3025_v3, 0  ;;  %v3391_v11 = vld [vmem:[%s4452_s3 + $0x108] ss:$40 sps:$4 sm:$0xff]   ;;  %v3396_v13 = vld [vmem:[%s4452_s3 + $0x15c] ss:$40 sps:$4 sm:$0xff]  }
 0x187   : > { %v1453_v22 = vmax.f32 %v1451_v35, 0.0  ;;  %v1454_v44 = vmax.f32 %v1452_v36, 0.0  ;;  %v1510_v37 = vld [vmem:[%s4452_s3 + $0x1a8] sm:$0x33]  ;;  %v3394_v19 = vld [vmem:[%s4452_s3 + $0x158] ss:$40 sps:$4 sm:$0xff]  }
 0x188   : > { %v1410_v23 = vadd.f32 %v2970_v55, %v1401_v16  ;;  %v1411_v48 = vmax.f32 %v1409_v42, 0.0  ;;  %v3028_v45 = vcombine.high %v1510_v37, %v1510_v37  ;;  %v3027_v39 = vcombine.low %v1510_v37, %v1510_v37  ;;  %v3401_v47 = vld [vmem:[%s4454_s5 + $0x4] ss:$20 sps:$4 sm:$0xff]   ;;  %v3399_v17 = vld [vmem:[%s4454_s5] ss:$20 sps:$4 sm:$0xff]  }
 0x189   : > { %v4064_v46 = vpack.c.bf16 %v1454_v44, %v1453_v22  ;;  %v3402_v62 = vld [vmem:[%s4454_s5 + $0x10] ss:$20 sps:$4 sm:$0xff]   ;;  %v3473_v55 = vmov 0.0   ;;  %v3405_v57 = vld [vmem:[%s4454_s5 + $0x2c] ss:$20 sps:$4 sm:$0xff]  }
 0x18a   : > { %v1412_v49 = vmax.f32 %v1410_v23, 0.0  ;;  %v1814_v21 = vsel %vm1794_vm1, %v3027_v39, 0  ;;  %3119 = vmatprep.subr.bf16.mxu0 %v3473_v55  ;;  %v3403_v24 = vld [vmem:[%s4454_s5 + $0x28] ss:$20 sps:$4 sm:$0xff]   ;;  %v3406_v25 = vld [vmem:[%s4454_s5 + $0x38] ss:$20 sps:$4 sm:$0xff]  }
 0x18b   : > { %v3409_v2 = vld [vmem:[%s4454_s5 + $0x54] ss:$20 sps:$4 sm:$0xff]   ;;  %v3407_v26 = vld [vmem:[%s4454_s5 + $0x50] ss:$20 sps:$4 sm:$0xff]   ;;  %v3411_v35 = vld [vmem:[%s4454_s5 + $0x78] ss:$20 sps:$4 sm:$0xff]  }
 0x18c   : > { %v4069_v12 = vpack.c.bf16 %v1412_v49, %v1411_v48  ;;  %v3410_v58 = vld [vmem:[%s4454_s5 + $0x60] ss:$20 sps:$4 sm:$0xff]   ;;  %v3413_v60 = vld [vmem:[%s4454_s5 + $0x7c] ss:$20 sps:$4 sm:$0xff]   ;;  %v3417_v42 = vld [vmem:[%s4454_s5 + $0xa4] ss:$20 sps:$4 sm:$0xff]  }
 0x18d   : > { %v3414_v36 = vld [vmem:[%s4454_s5 + $0x88] ss:$20 sps:$4 sm:$0xff]   ;;  %v3415_v16 = vld [vmem:[%s4454_s5 + $0xa0] ss:$20 sps:$4 sm:$0xff]   ;;  %v3418_v22 = vld [vmem:[%s4454_s5 + $0xb0] ss:$20 sps:$4 sm:$0xff]  }
 0x18e   : > { %3032 = vmatmul.mubr.msk.bf16.vlgmr.msra.gmra.mrb[16].mxu1 %vm1787_vm3, %v4069_v12  ;;  %3044 = vmatmul.mubr.msk.bf16.vlgmr.msra.gmra.mrb[40].mxu0 %vm1787_vm3, %v4069_v12  ;;  %v3421_v44 = vld [vmem:[%s4454_s5 + $0xc] ss:$20 sps:$4 sm:$0xff]  }
 0x18f   : > { %1879 = vmatpush1.bf16.msra.mxu1 %v3348_v20  ;;  %1867 = vmatprep.mubr.bf16.mxu1 %v3472_v10 }
 0x190   : > { %1880 = vmatprep.subr.bf16.mxu1 %v3353_v18  ;;  %2079 = vmatprep.mubr.bf16.mxu0 %v3472_v10 }
 0x191   : > { %3120 = vmatpush3.bf16.msra.mxu0 %v3402_v62 }
 0x192   : > { %3121 = vmatprep.subr.bf16.mxu0 %v3473_v55 }
 0x193   : > { %1881 = vmatpush1.bf16.msra.mxu1 %v3351_v8 }
 0x194   : > { %1882 = vmatprep.subr.bf16.mxu1 %v3356_v50 }
 0x195   : > { %3122 = vmatpush3.bf16.msra.mxu0 %v3406_v25 }
 0x196   : > { %3033 = vmatmul.mubr.msk.bf16.gmra.mrb[20].mxu1 %vm1787_vm3, %v4064_v46  ;;  %3045 = vmatmul.mubr.msk.bf16.gmra.mrb[44].mxu0 %vm1787_vm3, %v4064_v46 }
 0x197   : > { %1883 = vmatpush1.bf16.msra.mxu1 %v3354_v51  ;;  %1910 = vmatprep.mubr.bf16.mxu1 %v3472_v10 }
 0x198   : > { %1884 = vmatprep.subr.bf16.mxu1 %v3359_v9  ;;  %3123 = vmatprep.subr.bf16.mxu0 %v3473_v55 }
 0x199   : > { %3124 = vmatpush3.bf16.msra.mxu0 %v3410_v58  ;;  %3129 = vmatprep.mubr.msk.bf16.mxu0 %vm3474_vm4, %v3473_v55 }
 0x19a   : > { %3125 = vmatprep.subr.bf16.mxu0 %v3473_v55 }
 0x19b   : > { %1885 = vmatpush1.bf16.msra.mxu1 %v3357_v52 }
 0x19c   : > { %1886 = vmatprep.subr.bf16.mxu1 %v3362_v28 }
 0x19d   : > { %3126 = vmatpush3.bf16.msra.mxu0 %v3414_v36 }
 0x19e   : > { %3127 = vmatprep.subr.bf16.mxu0 %v3473_v55 }
 0x19f   : > { %1887 = vmatpush1.bf16.msra.mxu1 %v3360_v29 }
 0x1a0   : > { %3034 = vmatprep.subr.msk.bf16.mxu1 %vm1794_vm1, %v3024_v54 }
 0x1a1   : > { %3128 = vmatpush3.bf16.msra.mxu0 %v3418_v22 }
 0x1a2   : > { %3153 = vmatprep.subr.bf16.mxu0 %v3473_v55 }
 0x1a3   : > { %1889 = vmatpush1.bf16.msra.mxu1 %v1802_v56 }
 0x1a4   : > { %1931 = vmatprep.subr.bf16.mxu1 %v3367_v31 }
 0x1a6   : > { %3035 = vmatmul.mubr.msk.bf16.vlgmr.msra.gmra.mrb[24].mxu1 %vm1787_vm3, %v4069_v12 }
 0x1a7   : > { %1932 = vmatpush1.bf16.msra.mxu1 %v3365_v63  ;;  %1920 = vmatprep.mubr.bf16.mxu1 %v3472_v10 }
 0x1a8   : > { %1933 = vmatprep.subr.bf16.mxu1 %v3370_v0 }
 0x1ab   : > { %1934 = vmatpush1.bf16.msra.mxu1 %v3368_v14 }
 0x1ac   : > { %1935 = vmatprep.subr.bf16.mxu1 %v3373_v15 }
 0x1ae   : > { %3036 = vmatmul.mubr.msk.bf16.gmra.mrb[16].mxu1 %vm1787_vm3, %v4064_v46 }
 0x1af   : > { %1936 = vmatpush1.bf16.msra.mxu1 %v3371_v32  ;;  %1963 = vmatprep.mubr.bf16.mxu1 %v3472_v10 }
 0x1b0   : > { %1937 = vmatprep.subr.bf16.mxu1 %v3376_v33 }
 0x1b3   : > { %1938 = vmatpush1.bf16.msra.mxu1 %v3374_v4 }
 0x1b4   : > { %1939 = vmatprep.subr.bf16.mxu1 %v3379_v5 }
 0x1b7   : > { %1940 = vmatpush1.bf16.msra.mxu1 %v3377_v61 }
 0x1b8   : > { %3037 = vmatprep.subr.msk.bf16.mxu1 %vm1794_vm1, %v3026_v1 }
 0x1bb   : > { %1942 = vmatpush1.bf16.msra.mxu1 %v1808_v38 }
 0x1bc   : > { %1984 = vmatprep.subr.bf16.mxu1 %v3384_v6 }
 0x1be   : > { %3038 = vmatmul.mubr.msk.bf16.vlgmr.msra.gmra.mrb[28].mxu1 %vm1787_vm3, %v4069_v12 }
 0x1bf   : > { %1985 = vmatpush1.bf16.msra.mxu1 %v3382_v40  ;;  %1973 = vmatprep.mubr.bf16.mxu1 %v3472_v10 }
 0x1c0   : > { %1986 = vmatprep.subr.bf16.mxu1 %v3387_v41 }
 0x1c3   : > { %1987 = vmatpush1.bf16.msra.mxu1 %v3385_v7 }
 0x1c4   : > { %1988 = vmatprep.subr.bf16.mxu1 %v3390_v43 }
 0x1c6   : > { %3039 = vmatmul.mubr.msk.bf16.gmra.mrb[32].mxu1 %vm1787_vm3, %v4064_v46 }
 0x1c7   : > { %1989 = vmatpush1.bf16.msra.mxu1 %v3388_v27  ;;  %2016 = vmatprep.mubr.bf16.mxu1 %v3472_v10 }
 0x1c8   : > { %1990 = vmatprep.subr.bf16.mxu1 %v3393_v34 }
 0x1cb   : > { %1991 = vmatpush1.bf16.msra.mxu1 %v3391_v11 }
 0x1cc   : > { %1992 = vmatprep.subr.bf16.mxu1 %v3396_v13 }
 0x1cf   : > { %1993 = vmatpush1.bf16.msra.mxu1 %v3394_v19 }
 0x1d0   : > { %3040 = vmatprep.subr.msk.bf16.mxu1 %vm1794_vm1, %v3028_v45 }
 0x1d3   : > { %1995 = vmatpush1.bf16.msra.mxu1 %v1814_v21 }
 0x1d4   : > { %2417 = vmatprep.subr.bf16.mxu1 %v3401_v47 }
 0x1d6   : > { %3041 = vmatmul.mubr.msk.bf16.vlgmr.msra.gmra.mrb[36].mxu1 %vm1787_vm3, %v4069_v12 }
 0x1d7   : > { %2026 = vmatprep.mubr.bf16.mxu1 %v3472_v10  ;;  %2418 = vmatpush1.bf16.msra.mxu1 %v3399_v17 }
 0x1d8   : > { %2419 = vmatprep.subr.bf16.mxu1 %v3405_v57 }
 0x1db   : > { %2420 = vmatpush1.bf16.msra.mxu1 %v3403_v24 }
 0x1dc   : > { %2421 = vmatprep.subr.bf16.mxu1 %v3409_v2 }
 0x1de   : > { %3042 = vmatmul.mubr.msk.bf16.gmra.mrb[40].mxu1 %vm1787_vm3, %v4064_v46 }
 0x1df   : > { %2449 = vmatprep.mubr.bf16.mxu1 %v3472_v10  ;;  %2422 = vmatpush1.bf16.msra.mxu1 %v3407_v26 }
 0x1e0   : > { %2423 = vmatprep.subr.bf16.mxu1 %v3413_v60 }
 0x1e3   : > { %2424 = vmatpush1.bf16.msra.mxu1 %v3411_v35 }
 0x1e4   : > { %2425 = vmatprep.subr.bf16.mxu1 %v3417_v42 }
 0x1e7   : > { %2426 = vmatpush1.bf16.msra.mxu1 %v3415_v16 }
 0x1e8   : > { %2460 = vmatprep.subr.bf16.mxu1 %v3421_v44 }
 0x261   : > { %v2071_v23 = vpop.f32.mrb[40].mxu0 }
 0x262   : > { %v2073_v46 = vpop.f32.mrb[41].mxu0  ;;  %v2137_v49 = vrot.slane %v2071_v23, 2 }
 0x263   : > { %v4255_v48 = vpop.f32.mrb[42].mxu0  ;;  %v2140_v18 = vrot.slane %v2073_v46, 2 }
 0x264   : > { %v2138_v20 = vrot.slane %v4255_v48, 2  ;;  %v4258_v12 = vpop.f32.mrb[43].mxu0  ;;  %v3046_v48 = vld [vmem:[%s4453_s4] ss:$0 sm:$0xff] }
 0x265   : > { %v2141_v8 = vrot.slane %v4258_v12, 2 }
 0x266   : > { %v4264_v50 = vsel %vm2130_vm5, %v2137_v49, %v2138_v20 }
 0x267   : > { %v4269_v51 = vsel %vm2130_vm5, %v2140_v18, %v2141_v8 }
 0x269   : > { %v1869_v9 = vpop.f32.mrb[20].mxu1  ;;  %v2081_v52 = vpop.f32.mrb[44].mxu0 }
 0x26a   : > { %v1871_v28 = vpop.f32.mrb[21].mxu1  ;;  %v2083_v53 = vpop.f32.mrb[45].mxu0  ;;  %v2191_v30 = vrot.slane %v2081_v52, 2 }
 0x26b   : > { %v1873_v29 = vpop.f32.mrb[22].mxu1  ;;  %v4271_v54 = vpop.f32.mrb[46].mxu0  ;;  %v2194_v0 = vrot.slane %v2083_v53, 2 }
 0x26c   : > { %v2192_v56 = vrot.slane %v4271_v54, 2  ;;  %v1875_v31 = vpop.f32.mrb[23].mxu1  ;;  %v4274_v63 = vpop.f32.mrb[47].mxu0 }
 0x26d   : > { %v2195_v14 = vrot.slane %v4274_v63, 2 }
 0x26e   : > { %v4280_v15 = vsel %vm2130_vm5, %v2191_v30, %v2192_v56 }
 0x26f   : > { %v4285_v32 = vsel %vm2130_vm5, %v2194_v0, %v2195_v14 }
 0x279   : > { %v1912_v33 = vpop.f32.mrb[24].mxu1 }
 0x27a   : > { %v1914_v4 = vpop.f32.mrb[25].mxu1  ;;  %v2098_v59 = vrot.slane %v1912_v33, 1 }
 0x27b   : > { %v1916_v5 = vpop.f32.mrb[26].mxu1  ;;  %v2101_v3 = vrot.slane %v1914_v4, 1 }
 0x27c   : > { %v2099_v61 = vrot.slane %v1916_v5, 1  ;;  %v1918_v1 = vpop.f32.mrb[27].mxu1 }
 0x27d   : > { %v2102_v38 = vrot.slane %v1918_v1, 1 }
 0x27e   : > { %v2100_v6 = vsel %vm1219_vm2, %v2098_v59, %v2099_v61  ;;  %v2118_v40 = vsel %vm1219_vm2, %v2099_v61, 0.0 }
 0x27f   : > { %v2219_v41 = vadd.f32 %v2100_v6, %v1869_v9  ;;  %v2221_v7 = vadd.f32 %v2118_v40, %v1873_v29  ;;  %v2103_v43 = vsel %vm1219_vm2, %v2101_v3, %v2102_v38  ;;  %v2119_v27 = vsel %vm1219_vm2, %v2102_v38, 0.0 }
 0x280   : > { %v2220_v34 = vadd.f32 %v2103_v43, %v1871_v28  ;;  %v2222_v11 = vadd.f32 %v2119_v27, %v1875_v31 }
 0x281   : > { %v1922_v13 = vpop.f32.mrb[16].mxu1 }
 0x282   : > { %v1924_v37 = vpop.f32.mrb[17].mxu1 }
 0x283   : > { %v1926_v19 = vpop.f32.mrb[18].mxu1 }
 0x284   : > { %v1928_v45 = vpop.f32.mrb[19].mxu1 }
 0x291   : > { %v1965_v39 = vpop.f32.mrb[28].mxu1 }
 0x292   : > { %v1967_v21 = vpop.f32.mrb[29].mxu1  ;;  %v2104_v17 = vrot.slane %v1965_v39, 1 }
 0x293   : > { %v1969_v47 = vpop.f32.mrb[30].mxu1  ;;  %v2107_v24 = vrot.slane %v1967_v21, 1 }
 0x294   : > { %v2105_v62 = vrot.slane %v1969_v47, 1  ;;  %v1971_v57 = vpop.f32.mrb[31].mxu1 }
 0x295   : > { %v2108_v25 = vrot.slane %v1971_v57, 1 }
 0x296   : > { %v2106_v2 = vsel %vm1219_vm2, %v2104_v17, %v2105_v62  ;;  %v2120_v26 = vsel %vm1219_vm2, %v2105_v62, 0.0 }
 0x297   : > { %v2207_v58 = vadd.f32 %v2106_v2, %v1922_v13  ;;  %v2209_v60 = vadd.f32 %v2120_v26, %v1926_v19  ;;  %v2109_v35 = vsel %vm1219_vm2, %v2107_v24, %v2108_v25  ;;  %v2121_v36 = vsel %vm1219_vm2, %v2108_v25, 0.0 }
 0x298   : > { %v2208_v42 = vadd.f32 %v2109_v35, %v1924_v37  ;;  %v2210_v16 = vadd.f32 %v2121_v36, %v1928_v45  ;;  %v2202_v45 = vsel %vm2130_vm5, %v2195_v14, 0.0 }
 0x299   : > { %v1975_v22 = vpop.f32.mrb[32].mxu1 }
 0x29a   : > { %v1977_v44 = vpop.f32.mrb[33].mxu1  ;;  %v2163_v46 = vrot.slane %v1975_v22, 1 }
 0x29b   : > { %v1979_v23 = vpop.f32.mrb[34].mxu1  ;;  %v2166_v9 = vrot.slane %v1977_v44, 1 }
 0x29c   : > { %v2164_v49 = vrot.slane %v1979_v23, 1  ;;  %v1981_v18 = vpop.f32.mrb[35].mxu1 }
 0x29d   : > { %v2167_v52 = vrot.slane %v1981_v18, 1 }
 0x29e   : > { %v2165_v28 = vsel %vm1219_vm2, %v2163_v46, %v2164_v49  ;;  %v2183_v53 = vsel %vm1219_vm2, %v2164_v49, 0.0  ;;  %v2154_v46 = vsel %vm2130_vm5, %v2141_v8, 0.0 }
 0x29f   : > { %v2223_v29 = vadd.f32 %v2219_v41, %v2165_v28  ;;  %v2225_v30 = vadd.f32 %v2221_v7, %v2183_v53  ;;  %v2168_v31 = vsel %vm1219_vm2, %v2166_v9, %v2167_v52  ;;  %v2184_v0 = vsel %vm1219_vm2, %v2167_v52, 0.0 }
 0x2a0   : > { %v2224_v33 = vadd.f32 %v2220_v34, %v2168_v31  ;;  %v2226_v4 = vadd.f32 %v2222_v11, %v2184_v0  ;;  %v2201_v34 = vsel %vm2130_vm5, %v2192_v56, 0.0  ;;  %v3422_v31 = vld [vmem:[%s4454_s5 + $0x30] ss:$20 sps:$4 sm:$0xff]  }
 0x2a1   : > { %v3427_v0 = vld [vmem:[%s4454_s5 + $0x5c] ss:$20 sps:$4 sm:$0xff]  }
 0x2a9   : > { %v2018_v5 = vpop.f32.mrb[36].mxu1 }
 0x2aa   : > { %v2020_v59 = vpop.f32.mrb[37].mxu1  ;;  %v2131_v1 = vrot.slane %v2018_v5, 2  ;;  %v3433_v5 = vld [vmem:[%s4454_s5 + $0xac] ss:$20 sps:$4 sm:$0xff]  }
 0x2ab   : > { %v2022_v61 = vpop.f32.mrb[38].mxu1  ;;  %v2134_v6 = vrot.slane %v2020_v59, 2  ;;  %v3431_v59 = vld [vmem:[%s4454_s5 + $0xa8] ss:$20 sps:$4 sm:$0xff]  }
 0x2ac   : > { %v2132_v3 = vrot.slane %v2022_v61, 2  ;;  %v2024_v38 = vpop.f32.mrb[39].mxu1  ;;  %v3434_v61 = vld [vmem:[%s4456_s7] sm:$0xff]  }
 0x2ad   : > { %v2135_v40 = vrot.slane %v2024_v38, 2  ;;  %v3437_v38 = vld [vmem:[%s4456_s7 + $0x18] sm:$0xff]  }
 0x2ae   : > { %v2133_v43 = vsel %vm2130_vm5, %v2131_v1, %v2132_v3  ;;  %v2151_v27 = vsel %vm2130_vm5, %v2132_v3, 0.0  ;;  %v3435_v1 = vld [vmem:[%s4456_s7 + $0x8] sm:$0xff]   ;;  %v3436_v3 = vld [vmem:[%s4456_s7 + $0x10] sm:$0xff]  }
 0x2af   : > { %v2227_v41 = vadd.f32 %v2223_v29, %v2133_v43  ;;  %v2229_v7 = vadd.f32 %v2225_v30, %v2151_v27  ;;  %v2136_v13 = vsel %vm2130_vm5, %v2134_v6, %v2135_v40  ;;  %v2152_v37 = vsel %vm2130_vm5, %v2135_v40, 0.0  ;;  %v3424_v30 = vld [vmem:[%s4454_s5 + $0x34] ss:$20 sps:$4 sm:$0xff]   ;;  %v3438_v6 = vld [vmem:[%s4456_s7 + $0x20] sm:$0xff]   ;;  %v3441_v27 = vld [vmem:[%s4456_s7 + $0x38] ss:$0 sps:$4 sm:$0xff]  }
 0x2b0   : > { %v2228_v11 = vadd.f32 %v2224_v33, %v2136_v13  ;;  %v2230_v19 = vadd.f32 %v2226_v4, %v2152_v37  ;;  %v3425_v33 = vld [vmem:[%s4454_s5 + $0x58] ss:$20 sps:$4 sm:$0xff]   ;;  %v3440_v43 = vld [vmem:[%s4456_s7 + $0x30] sm:$0xff]  }
 0x2b1   : > { %v2231_v39 = vadd.f32 %v2227_v41, %v4280_v15  ;;  %v2233_v21 = vadd.f32 %v2229_v7, %v2201_v34  ;;  %v2028_v47 = vpop.f32.mrb[40].mxu1  ;;  %v3430_v4 = vld [vmem:[%s4454_s5 + $0x84] ss:$20 sps:$4 sm:$0xff]   ;;  %v3439_v40 = vld [vmem:[%s4456_s7 + $0x28] sm:$0xff]   ;;  %v2670_v41 = vsel %vm2577_vm7, %v3441_v27, 0  ;;  %v3444_v37 = vld [vmem:[%s4458_s9 + $0x10] sm:$0xff]  }
 0x2b2   : > { %v2232_v17 = vadd.f32 %v2228_v11, %v4285_v32  ;;  %v2234_v62 = vadd.f32 %v2230_v19, %v2202_v45  ;;  %v2030_v57 = vpop.f32.mrb[41].mxu1  ;;  %v2169_v25 = vrot.slane %v2028_v47, 1  ;;  %v2153_v32 = vsel %vm2130_vm5, %v2138_v20, 0.0  ;;  %v3442_v7 = vld [vmem:[%s4458_s9] sm:$0xff]   ;;  %v3443_v13 = vld [vmem:[%s4458_s9 + $0x8] sm:$0xff]   ;;  %v3445_v34 = vld [vmem:[%s4458_s9 + $0x18] sm:$0xff]  }
 0x2b3   : > { %v2032_v24 = vpop.f32.mrb[42].mxu1  ;;  %v2172_v26 = vrot.slane %v2030_v57, 1 }
 0x2b4   : > { %v2170_v2 = vrot.slane %v2032_v24, 1  ;;  %v2034_v54 = vpop.f32.mrb[43].mxu1 }
 0x2b5   : > { %v2173_v56 = vrot.slane %v2034_v54, 1 }
 0x2b6   : > { %v2171_v35 = vsel %vm1219_vm2, %v2169_v25, %v2170_v2  ;;  %v2185_v63 = vsel %vm1219_vm2, %v2170_v2, 0.0 }
 0x2b7   : > { %v2211_v36 = vadd.f32 %v2207_v58, %v2171_v35  ;;  %v2213_v14 = vadd.f32 %v2209_v60, %v2185_v63  ;;  %v2174_v15 = vsel %vm1219_vm2, %v2172_v26, %v2173_v56  ;;  %v2186_v22 = vsel %vm1219_vm2, %v2173_v56, 0.0 }
 0x2b8   : > { %v2212_v44 = vadd.f32 %v2208_v42, %v2174_v15  ;;  %v2214_v23 = vadd.f32 %v2210_v16, %v2186_v22 }
 0x2b9   : > { %v2215_v49 = vadd.f32 %v2211_v36, %v4264_v50  ;;  %v2217_v18 = vadd.f32 %v2213_v14, %v2153_v32  ;;  %v3419_v50 = vld [vmem:[%s4454_s5 + $0x8] ss:$20 sps:$4 sm:$0xff]  }
 0x2ba   : > { %v2216_v58 = vadd.f32 %v2212_v44, %v4269_v51  ;;  %v2218_v60 = vadd.f32 %v2214_v23, %v2154_v46 }
 0x2bb   : > { %v2235_v9 = vmax.f32 %v2215_v49, %v2231_v39  ;;  %v2237_v52 = vmax.f32 %v2217_v18, %v2233_v21 }
 0x2bc   : > { %v2236_v28 = vmax.f32 %v2216_v58, %v2232_v17  ;;  %v2238_v53 = vmax.f32 %v2218_v60, %v2234_v62 }
 0x2be   : > { %v2239_v20 = vmax.f32 %v2235_v9, %v2236_v28  ;;  %v2240_v42 = vmax.f32 %v2237_v52, %v2238_v53 }
 0x2c0   : > { %v2248_v16 = vadd.f32 %v3046_v48, %v2239_v20  ;;  %v2249_v12 = vadd.f32 %v3046_v48, %v2240_v42  ;;  %v3075_v20 = vld [vmem:[%s4455_s6] ss:$0 sm:$0xff] }
 0x2c2   : > { %v2250_v29 = vmax.f32 %v2248_v16, 0.0  ;;  %v2251_v8 = vmax.f32 %v2249_v12, 0.0 }
 0x2c4   : > { %v2252_v51 = vpack.c.bf16 %v2251_v8, %v2250_v29 }
 0x2c6   : > { %3072 = vmatmul.mubr.msk.bf16.vlgmr.msra.gmra.mrb[44].mxu1 %vm2413_vm6, %v2252_v51  ;;  %3130 = vmatmul.mubr.msk.bf16.vlgmr.msra.gmra.mrb[48].mxu0 %vm2413_vm6, %v2252_v51 }
 0x2c7   : > { %2461 = vmatpush1.bf16.msra.mxu1 %v3419_v50  ;;  %2492 = vmatprep.mubr.bf16.mxu1 %v3472_v10  ;;  %v3428_v10 = vld [vmem:[%s4454_s5 + $0x80] ss:$20 sps:$4 sm:$0xff]  }
 0x2c8   : > { %2462 = vmatprep.subr.bf16.mxu1 %v3424_v30  ;;  %3165 = vmatprep.mubr.msk.bf16.mxu0 %vm3474_vm4, %v3473_v55  ;;  %v3446_v30 = vld [vmem:[%s4458_s9 + $0x20] sm:$0xff]  }
 0x2c9   : > { %3154 = vmatpush3.bf16.msra.mxu0 %v3442_v7 }
 0x2ca   : > { %3155 = vmatprep.subr.bf16.mxu0 %v3473_v55 }
 0x2cb   : > { %2463 = vmatpush1.bf16.msra.mxu1 %v3422_v31  ;;  %v3447_v31 = vld [vmem:[%s4458_s9 + $0x28] ss:$0 sps:$4 sm:$0x33]  }
 0x2cc   : > { %2464 = vmatprep.subr.bf16.mxu1 %v3427_v0  ;;  %v2771_v0 = vsel %vm1794_vm1, %v3447_v31, 0 }
 0x2cd   : > { %3156 = vmatpush3.bf16.msra.mxu0 %v3443_v13 }
 0x2ce   : > { %3157 = vmatprep.subr.bf16.mxu0 %v3473_v55 }
 0x2cf   : > { %2465 = vmatpush1.bf16.msra.mxu1 %v3425_v33  ;;  %v3076_v33 = vld [vmem:[%s4457_s8] ss:$0 sm:$0xff] }
 0x2d0   : > { %2466 = vmatprep.subr.bf16.mxu1 %v3430_v4 }
 0x2d1   : > { %3158 = vmatpush3.bf16.msra.mxu0 %v3444_v37 }
 0x2d2   : > { %3159 = vmatprep.subr.bf16.mxu0 %v3473_v55 }
 0x2d3   : > { %2467 = vmatpush1.bf16.msra.mxu1 %v3428_v10 }
 0x2d4   : > { %2468 = vmatprep.subr.bf16.mxu1 %v3433_v5 }
 0x2d5   : > { %3160 = vmatpush3.bf16.msra.mxu0 %v3445_v34 }
 0x2d6   : > { %3161 = vmatprep.subr.bf16.mxu0 %v3473_v55 }
 0x2d7   : > { %2469 = vmatpush1.bf16.msra.mxu1 %v3431_v59 }
 0x2d8   : > { %3133 = vmatprep.subr.bf16.mxu1 %v3473_v55 }
 0x2d9   : > { %3162 = vmatpush3.bf16.msra.mxu0 %v3446_v30 }
 0x2da   : > { %3073 = vmatmul.mubr.msk.bf16.vlgmr.msra.gmra.mrb[48].mxu1 %vm2413_vm6, %v2252_v51  ;;  %3163 = vmatprep.subr.bf16.mxu0 %v3473_v55 }
 0x2db   : > { %3149 = vmatprep.mubr.msk.bf16.mxu1 %vm3474_vm4, %v3473_v55  ;;  %3134 = vmatpush3.bf16.msra.mxu1 %v3434_v61 }
 0x2dc   : > { %3135 = vmatprep.subr.bf16.mxu1 %v3473_v55 }
 0x2dd   : > { %3164 = vmatpush3.bf16.msra.mxu0 %v2771_v0 }
 0x2df   : > { %3136 = vmatpush3.bf16.msra.mxu1 %v3435_v1 }
 0x2e0   : > { %3137 = vmatprep.subr.bf16.mxu1 %v3473_v55 }
 0x2e3   : > { %3138 = vmatpush3.bf16.msra.mxu1 %v3436_v3 }
 0x2e4   : > { %3139 = vmatprep.subr.bf16.mxu1 %v3473_v55 }
 0x2e7   : > { %3140 = vmatpush3.bf16.msra.mxu1 %v3437_v38 }
 0x2e8   : > { %3141 = vmatprep.subr.bf16.mxu1 %v3473_v55 }
 0x2eb   : > { %3142 = vmatpush3.bf16.msra.mxu1 %v3438_v6  ;;  %v3086_v6 = vld [vmem:[%s4459_s10] ss:$0 sm:$0xff] }
 0x2ec   : > { %3143 = vmatprep.subr.bf16.mxu1 %v3473_v55 }
 0x2ef   : > { %3144 = vmatpush3.bf16.msra.mxu1 %v3439_v40 }
 0x2f0   : > { %3145 = vmatprep.subr.bf16.mxu1 %v3473_v55 }
 0x2f3   : > { %3146 = vmatpush3.bf16.msra.mxu1 %v3440_v43 }
 0x2f4   : > { %3147 = vmatprep.subr.bf16.mxu1 %v3473_v55 }
 0x2f7   : > { %3148 = vmatpush3.bf16.msra.mxu1 %v2670_v41 }
 0x399   : > { %v2451_v11 = vpop.f32.mrb[44].mxu1  ;;  %v2537_v19 = vpop.f32.mrb[48].mxu0 }
 0x39a   : > { %v2453_v45 = vpop.f32.mrb[45].mxu1  ;;  %v3131_v39 = vpop.f32.mrb[49].mxu0  ;;  %v2578_v17 = vrot.slane %v2537_v19, 4 }
 0x39b   : > { %v2455_v21 = vpop.f32.mrb[46].mxu1  ;;  %v2540_v47 = vpop.f32.mrb[50].mxu0  ;;  %v2546_v25 = vrot.slane %v2453_v45, 1 }
 0x39c   : > { %v2579_v62 = vrot.slane %v2540_v47, 4  ;;  %v2457_v57 = vpop.f32.mrb[47].mxu1  ;;  %v3132_v24 = vpop.f32.mrb[51].mxu0 }
 0x39d   : > { %v2547_v2 = vrot.slane %v2457_v57, 1 }
 0x39e   : > { %v2580_v54 = vsel %vm2577_vm7, %v2578_v17, %v2579_v62  ;;  %v2583_v48 = vsel %vm2577_vm7, %v2579_v62, 0.0 }
 0x39f   : > { %v2548_v26 = vsel %vm1219_vm2, %v2546_v25, %v2547_v2  ;;  %v2551_v56 = vsel %vm1219_vm2, %v2547_v2, 0.0 }
 0x3a0   : > { %v2552_v35 = vadd.f32 %v2548_v26, %v2451_v11  ;;  %v2553_v63 = vadd.f32 %v2551_v56, %v2455_v21 }
 0x3ad   : > { %v2494_v36 = vpop.f32.mrb[48].mxu1 }
 0x3ae   : > { %v2496_v14 = vpop.f32.mrb[49].mxu1  ;;  %v2556_v22 = vrot.slane %v2494_v36, 2 }
 0x3af   : > { %v2498_v15 = vpop.f32.mrb[50].mxu1  ;;  %v2567_v23 = vrot.slane %v2496_v14, 3 }
 0x3b0   : > { %v2557_v32 = vrot.slane %v2498_v15, 2  ;;  %v2500_v44 = vpop.f32.mrb[51].mxu1 }
 0x3b1   : > { %v2568_v46 = vrot.slane %v2500_v44, 3 }
 0x3b2   : > { %v2558_v49 = vsel %vm2130_vm5, %v2556_v22, %v2557_v32  ;;  %v2561_v18 = vsel %vm2130_vm5, %v2557_v32, 0.0 }
 0x3b3   : > { %v2562_v58 = vadd.f32 %v2558_v49, %v2552_v35  ;;  %v2563_v60 = vadd.f32 %v2561_v18, %v2553_v63  ;;  %v2569_v9 = vsel %vm2566_vm8, %v2567_v23, %v2568_v46  ;;  %v2572_v52 = vsel %vm2566_vm8, %v2568_v46, 0.0 }
 0x3b5   : > { %v2573_v28 = vadd.f32 %v2569_v9, %v2562_v58  ;;  %v2574_v53 = vadd.f32 %v2572_v52, %v2563_v60 }
 0x3b7   : > { %v2584_v42 = vadd.f32 %v2580_v54, %v2573_v28  ;;  %v2585_v16 = vadd.f32 %v2583_v48, %v2574_v53 }
 0x3b9   : > { %v2593_v12 = vadd.f32 %v3075_v20, %v2584_v42  ;;  %v2594_v29 = vadd.f32 %v3075_v20, %v2585_v16 }
 0x3bb   : > { %v2595_v8 = vmax.f32 %v2593_v12, 0.0  ;;  %v2596_v50 = vmax.f32 %v2594_v29, 0.0 }
 0x3bd   : > { %v2597_v51 = vpack.c.bf16 %v2596_v50, %v2595_v8 }
 0x3bf   : > { %3150 = vmatmul.mubr.msk.bf16.vlgmr.msra.gmra.mrb[52].mxu1 %vm2665_vm9, %v2597_v51 }
 0x492   : > { %v2706_v4 = vpop.f32.mrb[52].mxu1 }
 0x493   : > { %v2707_v10 = vadd.f32 %v3076_v33, %v2706_v4  ;;  %v3151_v5 = vpop.f32.mrb[53].mxu1 }
 0x494   : > { %v2709_v59 = vpop.f32.mrb[54].mxu1 }
 0x495   : > { %v2710_v61 = vadd.f32 %v3076_v33, %v2709_v59  ;;  %v3152_v1 = vpop.f32.mrb[55].mxu1  ;;  %v2713_v3 = vmax.f32 %v2707_v10, 0.0 }
 0x497   : > { %v2714_v38 = vmax.f32 %v2710_v61, 0.0 }
 0x499   : > { %v2715_v55 = vpack.c.bf16 %v2714_v38, %v2713_v3 }
 0x49b   : > { %3166 = vmatmul.mubr.msk.bf16.vlgmr.msra.gmra.mrb[52].mxu0 %vm1787_vm3, %v2715_v55 }
 0x56e   : > { %v2807_v40 = vpop.f32.mrb[52].mxu0 }
 0x56f   : > { %v2808_v43 = vadd.f32 %v3086_v6, %v2807_v40  ;;  %v3167_v27 = vpop.f32.mrb[53].mxu0 }
 0x570   : > { %v2810_v41 = vpop.f32.mrb[54].mxu0 }
 0x571   : > { %2815 = vst.msk [vmem:[%s450_s12] sm:$0xff] %vm2814_vm10, %v2808_v43  ;;  %v2811_v7 = vadd.f32 %v3086_v6, %v2810_v41  ;;  %v3168_v13 = vpop.f32.mrb[55].mxu0 }
 0x573   : > { %2816 = vst.msk [vmem:[%s450_s12 + $0x8] sm:$0xff] %vm2814_vm10, %v2811_v7 }
 0x574 PF: > { %p18_p9 = scmp.ge.s32.totalorder %s3552_s21, 4   ;;  %s4461_s17 = smov %s3466_s18 }
 0x575   : > { %s4462_s18 = smov %s3561_s24  ;;  %s4463_s19 = smov %s3552_s21 }
 0x576   :  { %20 = sbr.rel (!%p18_p9) target bundleno = 2 (0x2), region = 137 }

</bundles_post_ra>
